<compile_context>
chip_gen: v7x
topology: tpu7x:2x2x1
jax: 0.10.0
libtpu: 0.0.40
codegen_flags: <defaults>
</compile_context>

<pallas_src>
import math

import jax
import jax.numpy as jnp
import numpy as np
from jax import lax
from jax.experimental import pallas as pl
from jax.experimental.pallas import tpu as pltpu

# ---- model / problem sizes (small, consistent with the module) ----
D_MODEL = 32
NHEAD = 4
DH = D_MODEL // NHEAD
DIM_FF = 64
T = 8      # target (query) sequence length
S = 16     # memory sequence length
B = 2      # batch
LN_EPS = 1e-5

NBT = B * T              # 16 merged query rows (row = b*T + t)
NBS = B * S              # 32 merged memory rows (row = b*S + s)
HBT = NHEAD * NBT        # 64  block-diag key rows, self-attn
HBS = NHEAD * NBS        # 128 block-diag key rows, cross-attn

# mask-slab row offsets (all multiples of 16 -> aligned bf16 sublane tiles)
_MKV_T = 0
_BLK_T = _MKV_T + HBT            # 64
_BM_T = _BLK_T + HBT             # 128
_MKV_S = _BM_T + NBT             # 144
_BLK_S = _MKV_S + HBS            # 272
_BM_S = _BLK_S + HBS             # 400
MASK_ROWS = _BM_S + NBT          # 416

# weight-slab 128-lane block ids / bias-slab row ids
WB_SELF_QKV, WB_CROSS_QKV, WB_SELF_OUT, WB_CROSS_OUT, WB_FF1 = range(5)
(VB_SELF_QKV, VB_CROSS_QKV, VB_SELF_OUT, VB_CROSS_OUT, VB_FF1, VB_FF2,
 VB_N1W, VB_N1B, VB_N2W, VB_N2B, VB_N3W, VB_N3B) = range(12)


# ----------------------------- kernel helpers -----------------------------

def _dot(a, b, trans_b=False):
    """bf16 MXU matmul with f32 accumulation (both operands cast to bf16)."""
    dims = (((1,), (1,)), ((), ())) if trans_b else (((1,), (0,)), ((), ()))
    return lax.dot_general(a.astype(jnp.bfloat16), b.astype(jnp.bfloat16),
                           dims, preferred_element_type=jnp.float32)


def _layernorm(x, w, b):
    mu = jnp.mean(x, axis=-1, keepdims=True)
    var = jnp.mean((x - mu) ** 2, axis=-1, keepdims=True)
    return (x - mu) * lax.rsqrt(var + LN_EPS) * w + b


def _mha_all(q, k, v, mask_kv, blk, bmask):
    """All-batch, all-head scaled-dot-product attention in 3 wide matmuls.

    q: (B*T, D), already 1/sqrt(dh)-scaled (folded into Wq/bq).
    k, v: (B*Lk, D) batch-major.  Tiling k/v NHEAD times gives key-row order
    j = h*(B*Lk) + b*Lk + s; mask_kv zeroes all but head h's D-columns, blk is
    1 inside each (h, b) block, bmask is 1 where query-batch == key-batch.
    Subtracting the per-row (all-head, all-batch) max is softmax-invariant.
    """
    k_bd = jnp.concatenate([k] * NHEAD, axis=0) * mask_kv     # (H*B*Lk, D) f32
    v_bd = jnp.concatenate([v] * NHEAD, axis=0) * mask_kv
    s = _dot(q, k_bd, trans_b=True)                            # (B*T, H*B*Lk)
    s = s - (1.0 - bmask) * 1e9                                # kill cross-batch
    s = s - jnp.max(s, axis=-1, keepdims=True)
    p = jnp.exp(s)                                             # exactly 0 x-batch
    denom = _dot(p, blk)                                       # per-(h,b) sums
    # +(1-bmask): cross-batch blocks have denom==0 and p==0; keep recip finite.
    p = p * pl.reciprocal(denom + (1.0 - bmask), approx=True)  # EUP slot
    return _dot(p, v_bd)                                       # (B*T, D)


# ------------------------------- kernel ---------------------------------

def decoder_layer_kernel(self_in_ref, qpos_ref, crosskv_ref,
                         w_ref, w2t_ref, vec_ref, mask_ref, out_ref):
    f32 = jnp.float32
    D, F = D_MODEL, DIM_FF

    def W(blk_id, width):            # 128-aligned lane block of the weight slab
        return w_ref[:, blk_id * 128: blk_id * 128 + width]

    vec = vec_ref[...]               # (12, 128) f32 bias / LayerNorm slab

    def V(row, width):
        return vec[row:row + 1, 0:width]

    # precomputed constant masks (blk stays bf16: it is a matmul RHS)
    mkv_t = mask_ref[_MKV_T:_MKV_T + HBT, 0:D].astype(f32)
    blk_t = mask_ref[_BLK_T:_BLK_T + HBT, 0:HBT]
    bm_t = mask_ref[_BM_T:_BM_T + NBT, 0:HBT].astype(f32)
    mkv_s = mask_ref[_MKV_S:_MKV_S + HBS, 0:D].astype(f32)
    blk_s = mask_ref[_BLK_S:_BLK_S + HBS, 0:HBS]
    bm_s = mask_ref[_BM_S:_BM_S + NBT, 0:HBS].astype(f32)

    self_in = self_in_ref[...]       # rows 0:NBT = tgt+qpos, NBT:2*NBT = tgt
    tgt = self_in[NBT:, :]
    qpos = qpos_ref[...]             # (NBT, D)
    cross_kv = crosskv_ref[...]      # rows 0:NBS = mem+pos, NBS:2*NBS = mem

    # ---- self-attention: ONE fused (2*NBT, 3D) QKV projection ----
    sp = _dot(self_in, W(WB_SELF_QKV, 3 * D)) + V(VB_SELF_QKV, 3 * D)
    q_s = sp[:NBT, 0:D]              # 1/sqrt(dh) already folded into Wq / bq
    k_s = sp[:NBT, D:2 * D]
    v_s = sp[NBT:, 2 * D:3 * D]
    o_s = _mha_all(q_s, k_s, v_s, mkv_t, blk_t, bm_t)          # (NBT, D)
    sa = _dot(o_s, W(WB_SELF_OUT, D)) + V(VB_SELF_OUT, D)
    x = _layernorm(tgt + sa, V(VB_N1W, D), V(VB_N1B, D))

    # ---- cross-attention: ONE fused (NBT+2*NBS, 3D) QKV projection ----
    cstack = jnp.concatenate([x + qpos, cross_kv], axis=0)     # (80, D)
    cp = _dot(cstack, W(WB_CROSS_QKV, 3 * D)) + V(VB_CROSS_QKV, 3 * D)
    q_c = cp[:NBT, 0:D]
    k_c = cp[NBT:NBT + NBS, D:2 * D]
    v_c = cp[NBT + NBS:, 2 * D:3 * D]
    o_c = _mha_all(q_c, k_c, v_c, mkv_s, blk_s, bm_s)          # (NBT, D)
    ca = _dot(o_c, W(WB_CROSS_OUT, D)) + V(VB_CROSS_OUT, D)
    x = _layernorm(x + ca, V(VB_N2W, D), V(VB_N2B, D))

    # ---- feed-forward (relu; dropout / DropPath identity at inference) ----
    h = jnp.maximum(_dot(x, W(WB_FF1, F)) + V(VB_FF1, F), 0.0)
    f = _dot(h, w2t_ref[...]) + V(VB_FF2, D)
    x = _layernorm(x + f, V(VB_N3W, D), V(VB_N3B, D))

    out_ref[...] = x.astype(out_ref.dtype)                     # (NBT, D)

    # TODO(synk): attn_mask / key_padding_mask, hierarchical wd_pool and
    # use_proj_in_dec/reduce_backbone paths (all disabled / None here).


# ------------------------------- wrapper ---------------------------------

def transformer_decoder_layer(tgt, memory, query_pos, pos, packed):
    """tgt/query_pos: (T, B, D); memory/pos: (S, B, D). Returns (T, B, D)."""
    w_slab, w2_t, vec_slab, mask_slab = packed

    # Layout plumbing lives in the wrapper (fuses into producers for free):
    tgt_bm = jnp.transpose(tgt, (1, 0, 2)).reshape(NBT, D_MODEL)
    qpos_bm = jnp.transpose(query_pos, (1, 0, 2)).reshape(NBT, D_MODEL)
    mem_bm = jnp.transpose(memory, (1, 0, 2)).reshape(NBS, D_MODEL)
    pos_bm = jnp.transpose(pos, (1, 0, 2)).reshape(NBS, D_MODEL)
    self_in = jnp.concatenate([tgt_bm + qpos_bm, tgt_bm], axis=0)     # (32, D)
    cross_kv = jnp.concatenate([mem_bm + pos_bm, mem_bm], axis=0)     # (64, D)

    vmem = pl.BlockSpec(memory_space=pltpu.MemorySpace.VMEM)
    out = pl.pallas_call(
        decoder_layer_kernel,
        out_shape=jax.ShapeDtypeStruct((NBT, D_MODEL), jnp.float32),
        in_specs=[vmem] * 7,
        out_specs=vmem,
    )(self_in, qpos_bm, cross_kv, w_slab, w2_t, vec_slab, mask_slab)
    return jnp.transpose(out.reshape(B, T, D_MODEL), (1, 0, 2))


# --------------------------- parameter / mask setup -----------------------------

def make_params(key):
    """Raw parameters in PyTorch layout (in_proj (3D,D), out_proj (D,D), ...)."""
    D, F = D_MODEL, DIM_FF
    ks = jax.random.split(key, 18)

    def rnd(k, shape, scale=0.05):
        return jax.random.normal(k, shape, jnp.float32) * scale

    return dict(
        sa_in_w=rnd(ks[0], (3 * D, D)), sa_in_b=rnd(ks[1], (3 * D,)),
        sa_out_w=rnd(ks[2], (D, D)), sa_out_b=rnd(ks[3], (D,)),
        ca_in_w=rnd(ks[4], (3 * D, D)), ca_in_b=rnd(ks[5], (3 * D,)),
        ca_out_w=rnd(ks[6], (D, D)), ca_out_b=rnd(ks[7], (D,)),
        w1=rnd(ks[8], (F, D)), b1=rnd(ks[9], (F,)),
        w2=rnd(ks[10], (D, F)), b2=rnd(ks[11], (D,)),
        n1w=1.0 + rnd(ks[12], (D,)), n1b=rnd(ks[13], (D,)),
        n2w=1.0 + rnd(ks[14], (D,)), n2b=rnd(ks[15], (D,)),
        n3w=1.0 + rnd(ks[16], (D,)), n3b=rnd(ks[17], (D,)),
    )


def _make_masks(lk):
    """Exact integer batch+head block masks; key-row order j = h*(B*lk)+b*lk+s."""
    cols = NHEAD * B * lk
    j = np.arange(cols)
    head = j // (B * lk)
    kbatch = (j // lk) % B
    d = np.arange(D_MODEL)
    mask_kv = (d[None, :] // DH == head[:, None]).astype(np.float32)     # (cols, D)
    blk = ((j[:, None] // lk) == (j[None, :] // lk)).astype(np.float32)  # (cols, cols)
    row = np.arange(NBT)
    bmask = ((row // T)[:, None] == kbatch[None, :]).astype(np.float32)  # (B*T, cols)
    return mask_kv, blk, bmask


def pack_masks():
    mkv_t, blk_t, bm_t = _make_masks(T)
    mkv_s, blk_s, bm_s = _make_masks(S)

    def pad(m):
        return np.pad(m, ((0, 0), (0, 128 - m.shape[1])))

    slab = np.concatenate(
        [pad(m) for m in (mkv_t, blk_t, bm_t, mkv_s, blk_s, bm_s)], axis=0)
    assert slab.shape == (MASK_ROWS, 128)
    return jnp.asarray(slab, dtype=jnp.bfloat16)       # exact 0/1 values


def pack_params(raw):
    """Pack all weights into: a (D, 5*128) bf16 matrix slab (128-aligned blocks,
    fused [Wq|Wk|Wv] per attention, 1/sqrt(dh) folded into Wq/bq), a (F, D)
    bf16 second-FFN matrix, a (12, 128) f32 bias/LayerNorm slab, and the
    (416, 128) bf16 constant mask slab."""
    D = D_MODEL
    scale = 1.0 / math.sqrt(DH)

    def split3(w, b):
        return (w[:D], w[D:2 * D], w[2 * D:]), (b[:D], b[D:2 * D], b[2 * D:])

    (sWq, sWk, sWv), (sbq, sbk, sbv) = split3(raw["sa_in_w"], raw["sa_in_b"])
    (cWq, cWk, cWv), (cbq, cbk, cbv) = split3(raw["ca_in_w"], raw["ca_in_b"])

    def pad_cols(m, width=128):
        return jnp.pad(m, ((0, 0), (0, width - m.shape[1])))

    blocks = [
        jnp.concatenate([(scale * sWq).T, sWk.T, sWv.T], axis=1),  # self  Q|K|V
        jnp.concatenate([(scale * cWq).T, cWk.T, cWv.T], axis=1),  # cross Q|K|V
        raw["sa_out_w"].T,                                         # self out-proj
        raw["ca_out_w"].T,                                         # cross out-proj
        raw["w1"].T,                                               # FFN linear1
    ]
    w_slab = jnp.concatenate([pad_cols(b) for b in blocks],
                             axis=1).astype(jnp.bfloat16)          # (D, 640)

    rows = [
        jnp.concatenate([scale * sbq, sbk, sbv]),      # self fused bias (96)
        jnp.concatenate([scale * cbq, cbk, cbv]),      # cross fused bias (96)
        raw["sa_out_b"], raw["ca_out_b"],
        raw["b1"], raw["b2"],
        raw["n1w"], raw["n1b"], raw["n2w"], raw["n2b"], raw["n3w"], raw["n3b"],
    ]
    vec_slab = jnp.stack([jnp.pad(r, (0, 128 - r.shape[0])) for r in rows])

    w2_t = raw["w2"].T.astype(jnp.bfloat16)                        # (F, D)
    return w_slab, w2_t, vec_slab, pack_masks()


# ----------------------------- pure-JAX ref ------------------------------
# Independent of the kernel's packing / block-diagonal / bf16 tricks (f32).

def _ref_layernorm(x, w, b):
    mu = jnp.mean(x, axis=-1, keepdims=True)
    var = jnp.mean((x - mu) ** 2, axis=-1, keepdims=True)
    return (x - mu) / jnp.sqrt(var + LN_EPS) * w + b


def _ref_mha(q_in, k_in, v_in, in_w, in_b, out_w, out_b):
    D = q_in.shape[-1]
    wq, wk, wv = in_w[:D], in_w[D:2 * D], in_w[2 * D:]
    bq, bk, bv = in_b[:D], in_b[D:2 * D], in_b[2 * D:]
    q = (q_in @ wq.T + bq) / math.sqrt(DH)
    k = k_in @ wk.T + bk
    v = v_in @ wv.T + bv
    lq, lk = q.shape[0], k.shape[0]
    qh = q.reshape(lq, NHEAD, DH).transpose(1, 0, 2)
    kh = k.reshape(lk, NHEAD, DH).transpose(1, 0, 2)
    vh = v.reshape(lk, NHEAD, DH).transpose(1, 0, 2)
    s = jnp.einsum("htd,hsd->hts", qh, kh)
    p = jax.nn.softmax(s, axis=-1)
    o = jnp.einsum("hts,hsd->htd", p, vh).transpose(1, 0, 2).reshape(lq, D)
    return o @ out_w.T + out_b


def _ref_single(tgt, mem, qpos, pos, raw):
    qk = tgt + qpos
    sa = _ref_mha(qk, qk, tgt, raw["sa_in_w"], raw["sa_in_b"],
                  raw["sa_out_w"], raw["sa_out_b"])
    x = _ref_layernorm(tgt + sa, raw["n1w"], raw["n1b"])
    ca = _ref_mha(x + qpos, mem + pos, mem, raw["ca_in_w"], raw["ca_in_b"],
                  raw["ca_out_w"], raw["ca_out_b"])
    x = _ref_layernorm(x + ca, raw["n2w"], raw["n2b"])
    h = jnp.maximum(x @ raw["w1"].T + raw["b1"], 0.0)
    f = h @ raw["w2"].T + raw["b2"]
    return _ref_layernorm(x + f, raw["n3w"], raw["n3b"])


# --------------------------------- main ----------------------------------

if __name__ == "__main__":
    key = jax.random.PRNGKey(0)
    k_tgt, k_mem, k_qp, k_pos, k_par = jax.random.split(key, 5)

    tgt = jax.random.normal(k_tgt, (T, B, D_MODEL), jnp.float32)
    memory = jax.random.normal(k_mem, (S, B, D_MODEL), jnp.float32)
    query_pos = jax.random.normal(k_qp, (T, B, D_MODEL), jnp.float32)
    pos = jax.random.normal(k_pos, (S, B, D_MODEL), jnp.float32)

    raw = make_params(k_par)
    packed = pack_params(raw)

    out = transformer_decoder_layer(tgt, memory, query_pos, pos, packed)
    out = jax.block_until_ready(out)

    # cross-check against an independent pure-JAX f32 reference (batch via vmap)
    ref = jax.vmap(_ref_single, in_axes=(1, 1, 1, 1, None), out_axes=1)(
        tgt, memory, query_pos, pos, raw)

    assert out.shape == (T, B, D_MODEL)
    # tolerance covers bf16 matmul operands + the approximate EUP reciprocal
    np.testing.assert_allclose(np.asarray(out), np.asarray(ref),
                               atol=2e-2, rtol=2e-2)

    print("KERNEL_OK")
</pallas_src>

<mosaic_0001>
module attributes {stable_mosaic.version = 11 : i64} {
  func.func @decoder_layer_kernel(%arg0: memref<32x32xf32, #tpu.memory_space<vmem>>, %arg1: memref<16x32xf32, #tpu.memory_space<vmem>>, %arg2: memref<64x32xf32, #tpu.memory_space<vmem>>, %arg3: memref<32x640xbf16, #tpu.memory_space<vmem>>, %arg4: memref<64x32xbf16, #tpu.memory_space<vmem>>, %arg5: memref<12x128xf32, #tpu.memory_space<vmem>>, %arg6: memref<416x128xbf16, #tpu.memory_space<vmem>>, %arg7: memref<16x32xf32, #tpu.memory_space<vmem>>) attributes {dimension_semantics = [], scalar_prefetch = 0 : i64, scratch_operands = 0 : i64, tpu.core_type = #tpu.core_type<tc>} {
    %c0 = arith.constant 0 : index
    %c0_0 = arith.constant 0 : index
    %0 = vector.load %arg5[%c0, %c0_0] : memref<12x128xf32, #tpu.memory_space<vmem>>, vector<12x128xf32>
    %c0_1 = arith.constant 0 : index
    %c0_2 = arith.constant 0 : index
    %1 = vector.load %arg6[%c0_1, %c0_2] : memref<416x128xbf16, #tpu.memory_space<vmem>>, vector<64x32xbf16>
    %2 = arith.extf %1 : vector<64x32xbf16> to vector<64x32xf32>
    %c64 = arith.constant 64 : index
    %c0_3 = arith.constant 0 : index
    %3 = vector.load %arg6[%c64, %c0_3] : memref<416x128xbf16, #tpu.memory_space<vmem>>, vector<64x64xbf16>
    %c128 = arith.constant 128 : index
    %c0_4 = arith.constant 0 : index
    %4 = vector.load %arg6[%c128, %c0_4] : memref<416x128xbf16, #tpu.memory_space<vmem>>, vector<16x64xbf16>
    %5 = arith.extf %4 : vector<16x64xbf16> to vector<16x64xf32>
    %c144 = arith.constant 144 : index
    %c0_5 = arith.constant 0 : index
    %6 = vector.load %arg6[%c144, %c0_5] : memref<416x128xbf16, #tpu.memory_space<vmem>>, vector<128x32xbf16>
    %7 = arith.extf %6 : vector<128x32xbf16> to vector<128x32xf32>
    %c272 = arith.constant 272 : index
    %c0_6 = arith.constant 0 : index
    %8 = vector.load %arg6[%c272, %c0_6] : memref<416x128xbf16, #tpu.memory_space<vmem>>, vector<128x128xbf16>
    %c400 = arith.constant 400 : index
    %c0_7 = arith.constant 0 : index
    %9 = vector.load %arg6[%c400, %c0_7] : memref<416x128xbf16, #tpu.memory_space<vmem>>, vector<16x128xbf16>
    %10 = arith.extf %9 : vector<16x128xbf16> to vector<16x128xf32>
    %c0_8 = arith.constant 0 : index
    %c0_9 = arith.constant 0 : index
    %11 = vector.load %arg0[%c0_8, %c0_9] : memref<32x32xf32, #tpu.memory_space<vmem>>, vector<32x32xf32>
    %12 = vector.extract_strided_slice %11 {offsets = [16, 0], sizes = [16, 32], strides = [1, 1]} : vector<32x32xf32> to vector<16x32xf32>
    %c0_10 = arith.constant 0 : index
    %c0_11 = arith.constant 0 : index
    %13 = vector.load %arg1[%c0_10, %c0_11] : memref<16x32xf32, #tpu.memory_space<vmem>>, vector<16x32xf32>
    %c0_12 = arith.constant 0 : index
    %c0_13 = arith.constant 0 : index
    %14 = vector.load %arg2[%c0_12, %c0_13] : memref<64x32xf32, #tpu.memory_space<vmem>>, vector<64x32xf32>
    %c0_14 = arith.constant 0 : index
    %c0_15 = arith.constant 0 : index
    %15 = vector.load %arg3[%c0_14, %c0_15] : memref<32x640xbf16, #tpu.memory_space<vmem>>, vector<32x96xbf16>
    %16 = arith.truncf %11 : vector<32x32xf32> to vector<32x32xbf16>
    %cst = arith.constant dense<0.000000e+00> : vector<32x96xf32>
    %17 = tpu.matmul %16, %15, %cst {dimension_numbers = #tpu.dot_dimension_numbers<[1], [0], [0], [1], [0, 0, 1, 1], [], []>} : vector<32x32xbf16>, vector<32x96xbf16>, vector<32x96xf32> -> vector<32x96xf32>
    %18 = vector.extract_strided_slice %0 {offsets = [0, 0], sizes = [1, 96], strides = [1, 1]} : vector<12x128xf32> to vector<1x96xf32>
    %19 = vector.broadcast %18 : vector<1x96xf32> to vector<32x96xf32>
    %20 = arith.addf %17, %19 : vector<32x96xf32>
    %21 = vector.extract_strided_slice %20 {offsets = [0, 0], sizes = [16, 32], strides = [1, 1]} : vector<32x96xf32> to vector<16x32xf32>
    %22 = vector.extract_strided_slice %20 {offsets = [0, 32], sizes = [16, 32], strides = [1, 1]} : vector<32x96xf32> to vector<16x32xf32>
    %23 = vector.extract_strided_slice %20 {offsets = [16, 64], sizes = [16, 32], strides = [1, 1]} : vector<32x96xf32> to vector<16x32xf32>
    %24 = tpu.concatenate %22, %22, %22, %22 in 0 : vector<16x32xf32>, vector<16x32xf32>, vector<16x32xf32>, vector<16x32xf32> -> vector<64x32xf32>
    %25 = arith.mulf %24, %2 : vector<64x32xf32>
    %26 = tpu.concatenate %23, %23, %23, %23 in 0 : vector<16x32xf32>, vector<16x32xf32>, vector<16x32xf32>, vector<16x32xf32> -> vector<64x32xf32>
    %27 = arith.mulf %26, %2 : vector<64x32xf32>
    %28 = arith.truncf %21 : vector<16x32xf32> to vector<16x32xbf16>
    %29 = arith.truncf %25 : vector<64x32xf32> to vector<64x32xbf16>
    %cst_16 = arith.constant dense<0.000000e+00> : vector<16x64xf32>
    %30 = tpu.matmul %28, %29, %cst_16 {dimension_numbers = #tpu.dot_dimension_numbers<[1], [1], [0], [0], [0, 0, 1, 0], [], []>} : vector<16x32xbf16>, vector<64x32xbf16>, vector<16x64xf32> -> vector<16x64xf32>
    %cst_17 = arith.constant 1.000000e+00 : f32
    %31 = vector.broadcast %cst_17 : f32 to vector<16x64xf32>
    %32 = arith.subf %31, %5 : vector<16x64xf32>
    %cst_18 = arith.constant 1.000000e+09 : f32
    %33 = vector.broadcast %cst_18 : f32 to vector<16x64xf32>
    %34 = arith.mulf %32, %33 : vector<16x64xf32>
    %35 = arith.subf %30, %34 : vector<16x64xf32>
    %cst_19 = arith.constant dense<0xFF800000> : vector<16xf32>
    %36 = vector.multi_reduction <maximumf>, %35, %cst_19 [1] : vector<16x64xf32> to vector<16xf32>
    %37 = vector.shape_cast %36 : vector<16xf32> to vector<16x1xf32>
    %38 = vector.broadcast %37 : vector<16x1xf32> to vector<16x64xf32>
    %39 = arith.subf %35, %38 : vector<16x64xf32>
    %40 = math.exp %39 : vector<16x64xf32>
    %41 = arith.truncf %40 : vector<16x64xf32> to vector<16x64xbf16>
    %cst_20 = arith.constant dense<0.000000e+00> : vector<16x64xf32>
    %42 = tpu.matmul %41, %3, %cst_20 {dimension_numbers = #tpu.dot_dimension_numbers<[1], [0], [0], [1], [0, 0, 1, 1], [], []>} : vector<16x64xbf16>, vector<64x64xbf16>, vector<16x64xf32> -> vector<16x64xf32>
    %cst_21 = arith.constant 1.000000e+00 : f32
    %43 = vector.broadcast %cst_21 : f32 to vector<16x64xf32>
    %44 = arith.subf %43, %5 : vector<16x64xf32>
    %45 = arith.addf %42, %44 : vector<16x64xf32>
    %46 = tpu.reciprocal %45 {approx = true} : vector<16x64xf32> -> vector<16x64xf32>
    %47 = arith.mulf %40, %46 : vector<16x64xf32>
    %48 = arith.truncf %47 : vector<16x64xf32> to vector<16x64xbf16>
    %49 = arith.truncf %27 : vector<64x32xf32> to vector<64x32xbf16>
    %cst_22 = arith.constant dense<0.000000e+00> : vector<16x32xf32>
    %50 = tpu.matmul %48, %49, %cst_22 {dimension_numbers = #tpu.dot_dimension_numbers<[1], [0], [0], [1], [0, 0, 1, 1], [], []>} : vector<16x64xbf16>, vector<64x32xbf16>, vector<16x32xf32> -> vector<16x32xf32>
    %c0_23 = arith.constant 0 : index
    %c256 = arith.constant 256 : index
    %51 = vector.load %arg3[%c0_23, %c256] : memref<32x640xbf16, #tpu.memory_space<vmem>>, vector<32x32xbf16>
    %52 = arith.truncf %50 : vector<16x32xf32> to vector<16x32xbf16>
    %cst_24 = arith.constant dense<0.000000e+00> : vector<16x32xf32>
    %53 = tpu.matmul %52, %51, %cst_24 {dimension_numbers = #tpu.dot_dimension_numbers<[1], [0], [0], [1], [0, 0, 1, 1], [], []>} : vector<16x32xbf16>, vector<32x32xbf16>, vector<16x32xf32> -> vector<16x32xf32>
    %54 = vector.extract_strided_slice %0 {offsets = [2, 0], sizes = [1, 32], strides = [1, 1]} : vector<12x128xf32> to vector<1x32xf32>
    %55 = vector.broadcast %54 : vector<1x32xf32> to vector<16x32xf32>
    %56 = arith.addf %53, %55 : vector<16x32xf32>
    %57 = arith.addf %12, %56 : vector<16x32xf32>
    %58 = vector.extract_strided_slice %0 {offsets = [6, 0], sizes = [1, 32], strides = [1, 1]} : vector<12x128xf32> to vector<1x32xf32>
    %59 = vector.extract_strided_slice %0 {offsets = [7, 0], sizes = [1, 32], strides = [1, 1]} : vector<12x128xf32> to vector<1x32xf32>
    %cst_25 = arith.constant dense<0.000000e+00> : vector<16xf32>
    %60 = vector.multi_reduction <add>, %57, %cst_25 [1] : vector<16x32xf32> to vector<16xf32>
    %61 = vector.shape_cast %60 : vector<16xf32> to vector<16x1xf32>
    %cst_26 = arith.constant 3.200000e+01 : f32
    %62 = vector.broadcast %cst_26 : f32 to vector<16x1xf32>
    %63 = arith.divf %61, %62 : vector<16x1xf32>
    %64 = vector.broadcast %63 : vector<16x1xf32> to vector<16x32xf32>
    %65 = arith.subf %57, %64 : vector<16x32xf32>
    %66 = arith.mulf %65, %65 : vector<16x32xf32>
    %cst_27 = arith.constant dense<0.000000e+00> : vector<16xf32>
    %67 = vector.multi_reduction <add>, %66, %cst_27 [1] : vector<16x32xf32> to vector<16xf32>
    %68 = vector.shape_cast %67 : vector<16xf32> to vector<16x1xf32>
    %cst_28 = arith.constant 3.200000e+01 : f32
    %69 = vector.broadcast %cst_28 : f32 to vector<16x1xf32>
    %70 = arith.divf %68, %69 : vector<16x1xf32>
    %71 = vector.broadcast %63 : vector<16x1xf32> to vector<16x32xf32>
    %72 = arith.subf %57, %71 : vector<16x32xf32>
    %cst_29 = arith.constant 9.99999974E-6 : f32
    %73 = vector.broadcast %cst_29 : f32 to vector<16x1xf32>
    %74 = arith.addf %70, %73 : vector<16x1xf32>
    %75 = math.rsqrt %74 : vector<16x1xf32>
    %76 = vector.broadcast %75 : vector<16x1xf32> to vector<16x32xf32>
    %77 = arith.mulf %72, %76 : vector<16x32xf32>
    %78 = vector.broadcast %58 : vector<1x32xf32> to vector<16x32xf32>
    %79 = arith.mulf %77, %78 : vector<16x32xf32>
    %80 = vector.broadcast %59 : vector<1x32xf32> to vector<16x32xf32>
    %81 = arith.addf %79, %80 : vector<16x32xf32>
    %82 = arith.addf %81, %13 : vector<16x32xf32>
    %83 = tpu.concatenate %82, %14 in 0 : vector<16x32xf32>, vector<64x32xf32> -> vector<80x32xf32>
    %c0_30 = arith.constant 0 : index
    %c128_31 = arith.constant 128 : index
    %84 = vector.load %arg3[%c0_30, %c128_31] : memref<32x640xbf16, #tpu.memory_space<vmem>>, vector<32x96xbf16>
    %85 = arith.truncf %83 : vector<80x32xf32> to vector<80x32xbf16>
    %cst_32 = arith.constant dense<0.000000e+00> : vector<80x96xf32>
    %86 = tpu.matmul %85, %84, %cst_32 {dimension_numbers = #tpu.dot_dimension_numbers<[1], [0], [0], [1], [0, 0, 1, 1], [], []>} : vector<80x32xbf16>, vector<32x96xbf16>, vector<80x96xf32> -> vector<80x96xf32>
    %87 = vector.extract_strided_slice %0 {offsets = [1, 0], sizes = [1, 96], strides = [1, 1]} : vector<12x128xf32> to vector<1x96xf32>
    %88 = vector.broadcast %87 : vector<1x96xf32> to vector<80x96xf32>
    %89 = arith.addf %86, %88 : vector<80x96xf32>
    %90 = vector.extract_strided_slice %89 {offsets = [0, 0], sizes = [16, 32], strides = [1, 1]} : vector<80x96xf32> to vector<16x32xf32>
    %91 = vector.extract_strided_slice %89 {offsets = [16, 32], sizes = [32, 32], strides = [1, 1]} : vector<80x96xf32> to vector<32x32xf32>
    %92 = vector.extract_strided_slice %89 {offsets = [48, 64], sizes = [32, 32], strides = [1, 1]} : vector<80x96xf32> to vector<32x32xf32>
    %93 = tpu.concatenate %91, %91, %91, %91 in 0 : vector<32x32xf32>, vector<32x32xf32>, vector<32x32xf32>, vector<32x32xf32> -> vector<128x32xf32>
    %94 = arith.mulf %93, %7 : vector<128x32xf32>
    %95 = tpu.concatenate %92, %92, %92, %92 in 0 : vector<32x32xf32>, vector<32x32xf32>, vector<32x32xf32>, vector<32x32xf32> -> vector<128x32xf32>
    %96 = arith.mulf %95, %7 : vector<128x32xf32>
    %97 = arith.truncf %90 : vector<16x32xf32> to vector<16x32xbf16>
    %98 = arith.truncf %94 : vector<128x32xf32> to vector<128x32xbf16>
    %cst_33 = arith.constant dense<0.000000e+00> : vector<16x128xf32>
    %99 = tpu.matmul %97, %98, %cst_33 {dimension_numbers = #tpu.dot_dimension_numbers<[1], [1], [0], [0], [0, 0, 1, 0], [], []>} : vector<16x32xbf16>, vector<128x32xbf16>, vector<16x128xf32> -> vector<16x128xf32>
    %cst_34 = arith.constant 1.000000e+00 : f32
    %100 = vector.broadcast %cst_34 : f32 to vector<16x128xf32>
    %101 = arith.subf %100, %10 : vector<16x128xf32>
    %cst_35 = arith.constant 1.000000e+09 : f32
    %102 = vector.broadcast %cst_35 : f32 to vector<16x128xf32>
    %103 = arith.mulf %101, %102 : vector<16x128xf32>
    %104 = arith.subf %99, %103 : vector<16x128xf32>
    %cst_36 = arith.constant dense<0xFF800000> : vector<16xf32>
    %105 = vector.multi_reduction <maximumf>, %104, %cst_36 [1] : vector<16x128xf32> to vector<16xf32>
    %106 = vector.shape_cast %105 : vector<16xf32> to vector<16x1xf32>
    %107 = vector.broadcast %106 : vector<16x1xf32> to vector<16x128xf32>
    %108 = arith.subf %104, %107 : vector<16x128xf32>
    %109 = math.exp %108 : vector<16x128xf32>
    %110 = arith.truncf %109 : vector<16x128xf32> to vector<16x128xbf16>
    %cst_37 = arith.constant dense<0.000000e+00> : vector<16x128xf32>
    %111 = tpu.matmul %110, %8, %cst_37 {dimension_numbers = #tpu.dot_dimension_numbers<[1], [0], [0], [1], [0, 0, 1, 1], [], []>} : vector<16x128xbf16>, vector<128x128xbf16>, vector<16x128xf32> -> vector<16x128xf32>
    %cst_38 = arith.constant 1.000000e+00 : f32
    %112 = vector.broadcast %cst_38 : f32 to vector<16x128xf32>
    %113 = arith.subf %112, %10 : vector<16x128xf32>
    %114 = arith.addf %111, %113 : vector<16x128xf32>
    %115 = tpu.reciprocal %114 {approx = true} : vector<16x128xf32> -> vector<16x128xf32>
    %116 = arith.mulf %109, %115 : vector<16x128xf32>
    %117 = arith.truncf %116 : vector<16x128xf32> to vector<16x128xbf16>
    %118 = arith.truncf %96 : vector<128x32xf32> to vector<128x32xbf16>
    %cst_39 = arith.constant dense<0.000000e+00> : vector<16x32xf32>
    %119 = tpu.matmul %117, %118, %cst_39 {dimension_numbers = #tpu.dot_dimension_numbers<[1], [0], [0], [1], [0, 0, 1, 1], [], []>} : vector<16x128xbf16>, vector<128x32xbf16>, vector<16x32xf32> -> vector<16x32xf32>
    %c0_40 = arith.constant 0 : index
    %c384 = arith.constant 384 : index
    %120 = vector.load %arg3[%c0_40, %c384] : memref<32x640xbf16, #tpu.memory_space<vmem>>, vector<32x32xbf16>
    %121 = arith.truncf %119 : vector<16x32xf32> to vector<16x32xbf16>
    %cst_41 = arith.constant dense<0.000000e+00> : vector<16x32xf32>
    %122 = tpu.matmul %121, %120, %cst_41 {dimension_numbers = #tpu.dot_dimension_numbers<[1], [0], [0], [1], [0, 0, 1, 1], [], []>} : vector<16x32xbf16>, vector<32x32xbf16>, vector<16x32xf32> -> vector<16x32xf32>
    %123 = vector.extract_strided_slice %0 {offsets = [3, 0], sizes = [1, 32], strides = [1, 1]} : vector<12x128xf32> to vector<1x32xf32>
    %124 = vector.broadcast %123 : vector<1x32xf32> to vector<16x32xf32>
    %125 = arith.addf %122, %124 : vector<16x32xf32>
    %126 = arith.addf %81, %125 : vector<16x32xf32>
    %127 = vector.extract_strided_slice %0 {offsets = [8, 0], sizes = [1, 32], strides = [1, 1]} : vector<12x128xf32> to vector<1x32xf32>
    %128 = vector.extract_strided_slice %0 {offsets = [9, 0], sizes = [1, 32], strides = [1, 1]} : vector<12x128xf32> to vector<1x32xf32>
    %cst_42 = arith.constant dense<0.000000e+00> : vector<16xf32>
    %129 = vector.multi_reduction <add>, %126, %cst_42 [1] : vector<16x32xf32> to vector<16xf32>
    %130 = vector.shape_cast %129 : vector<16xf32> to vector<16x1xf32>
    %cst_43 = arith.constant 3.200000e+01 : f32
    %131 = vector.broadcast %cst_43 : f32 to vector<16x1xf32>
    %132 = arith.divf %130, %131 : vector<16x1xf32>
    %133 = vector.broadcast %132 : vector<16x1xf32> to vector<16x32xf32>
    %134 = arith.subf %126, %133 : vector<16x32xf32>
    %135 = arith.mulf %134, %134 : vector<16x32xf32>
    %cst_44 = arith.constant dense<0.000000e+00> : vector<16xf32>
    %136 = vector.multi_reduction <add>, %135, %cst_44 [1] : vector<16x32xf32> to vector<16xf32>
    %137 = vector.shape_cast %136 : vector<16xf32> to vector<16x1xf32>
    %cst_45 = arith.constant 3.200000e+01 : f32
    %138 = vector.broadcast %cst_45 : f32 to vector<16x1xf32>
    %139 = arith.divf %137, %138 : vector<16x1xf32>
    %140 = vector.broadcast %132 : vector<16x1xf32> to vector<16x32xf32>
    %141 = arith.subf %126, %140 : vector<16x32xf32>
    %cst_46 = arith.constant 9.99999974E-6 : f32
    %142 = vector.broadcast %cst_46 : f32 to vector<16x1xf32>
    %143 = arith.addf %139, %142 : vector<16x1xf32>
    %144 = math.rsqrt %143 : vector<16x1xf32>
    %145 = vector.broadcast %144 : vector<16x1xf32> to vector<16x32xf32>
    %146 = arith.mulf %141, %145 : vector<16x32xf32>
    %147 = vector.broadcast %127 : vector<1x32xf32> to vector<16x32xf32>
    %148 = arith.mulf %146, %147 : vector<16x32xf32>
    %149 = vector.broadcast %128 : vector<1x32xf32> to vector<16x32xf32>
    %150 = arith.addf %148, %149 : vector<16x32xf32>
    %c0_47 = arith.constant 0 : index
    %c512 = arith.constant 512 : index
    %151 = vector.load %arg3[%c0_47, %c512] : memref<32x640xbf16, #tpu.memory_space<vmem>>, vector<32x64xbf16>
    %152 = arith.truncf %150 : vector<16x32xf32> to vector<16x32xbf16>
    %cst_48 = arith.constant dense<0.000000e+00> : vector<16x64xf32>
    %153 = tpu.matmul %152, %151, %cst_48 {dimension_numbers = #tpu.dot_dimension_numbers<[1], [0], [0], [1], [0, 0, 1, 1], [], []>} : vector<16x32xbf16>, vector<32x64xbf16>, vector<16x64xf32> -> vector<16x64xf32>
    %154 = vector.extract_strided_slice %0 {offsets = [4, 0], sizes = [1, 64], strides = [1, 1]} : vector<12x128xf32> to vector<1x64xf32>
    %155 = vector.broadcast %154 : vector<1x64xf32> to vector<16x64xf32>
    %156 = arith.addf %153, %155 : vector<16x64xf32>
    %cst_49 = arith.constant 0.000000e+00 : f32
    %157 = vector.broadcast %cst_49 : f32 to vector<16x64xf32>
    %158 = arith.maximumf %156, %157 : vector<16x64xf32>
    %c0_50 = arith.constant 0 : index
    %c0_51 = arith.constant 0 : index
    %159 = vector.load %arg4[%c0_50, %c0_51] : memref<64x32xbf16, #tpu.memory_space<vmem>>, vector<64x32xbf16>
    %160 = arith.truncf %158 : vector<16x64xf32> to vector<16x64xbf16>
    %cst_52 = arith.constant dense<0.000000e+00> : vector<16x32xf32>
    %161 = tpu.matmul %160, %159, %cst_52 {dimension_numbers = #tpu.dot_dimension_numbers<[1], [0], [0], [1], [0, 0, 1, 1], [], []>} : vector<16x64xbf16>, vector<64x32xbf16>, vector<16x32xf32> -> vector<16x32xf32>
    %162 = vector.extract_strided_slice %0 {offsets = [5, 0], sizes = [1, 32], strides = [1, 1]} : vector<12x128xf32> to vector<1x32xf32>
    %163 = vector.broadcast %162 : vector<1x32xf32> to vector<16x32xf32>
    %164 = arith.addf %161, %163 : vector<16x32xf32>
    %165 = arith.addf %150, %164 : vector<16x32xf32>
    %166 = vector.extract_strided_slice %0 {offsets = [10, 0], sizes = [1, 32], strides = [1, 1]} : vector<12x128xf32> to vector<1x32xf32>
    %167 = vector.extract_strided_slice %0 {offsets = [11, 0], sizes = [1, 32], strides = [1, 1]} : vector<12x128xf32> to vector<1x32xf32>
    %cst_53 = arith.constant dense<0.000000e+00> : vector<16xf32>
    %168 = vector.multi_reduction <add>, %165, %cst_53 [1] : vector<16x32xf32> to vector<16xf32>
    %169 = vector.shape_cast %168 : vector<16xf32> to vector<16x1xf32>
    %cst_54 = arith.constant 3.200000e+01 : f32
    %170 = vector.broadcast %cst_54 : f32 to vector<16x1xf32>
    %171 = arith.divf %169, %170 : vector<16x1xf32>
    %172 = vector.broadcast %171 : vector<16x1xf32> to vector<16x32xf32>
    %173 = arith.subf %165, %172 : vector<16x32xf32>
    %174 = arith.mulf %173, %173 : vector<16x32xf32>
    %cst_55 = arith.constant dense<0.000000e+00> : vector<16xf32>
    %175 = vector.multi_reduction <add>, %174, %cst_55 [1] : vector<16x32xf32> to vector<16xf32>
    %176 = vector.shape_cast %175 : vector<16xf32> to vector<16x1xf32>
    %cst_56 = arith.constant 3.200000e+01 : f32
    %177 = vector.broadcast %cst_56 : f32 to vector<16x1xf32>
    %178 = arith.divf %176, %177 : vector<16x1xf32>
    %179 = vector.broadcast %171 : vector<16x1xf32> to vector<16x32xf32>
    %180 = arith.subf %165, %179 : vector<16x32xf32>
    %cst_57 = arith.constant 9.99999974E-6 : f32
    %181 = vector.broadcast %cst_57 : f32 to vector<16x1xf32>
    %182 = arith.addf %178, %181 : vector<16x1xf32>
    %183 = math.rsqrt %182 : vector<16x1xf32>
    %184 = vector.broadcast %183 : vector<16x1xf32> to vector<16x32xf32>
    %185 = arith.mulf %180, %184 : vector<16x32xf32>
    %186 = vector.broadcast %166 : vector<1x32xf32> to vector<16x32xf32>
    %187 = arith.mulf %185, %186 : vector<16x32xf32>
    %188 = vector.broadcast %167 : vector<1x32xf32> to vector<16x32xf32>
    %189 = arith.addf %187, %188 : vector<16x32xf32>
    %c0_58 = arith.constant 0 : index
    %c0_59 = arith.constant 0 : index
    %190 = vector.load %arg7[%c0_58, %c0_59] : memref<16x32xf32, #tpu.memory_space<vmem>>, vector<16x32xf32>
    tpu.vector_store %arg7[%c0_58, %c0_59], %189 {strides = array<i32>} : memref<16x32xf32, #tpu.memory_space<vmem>>, vector<16x32xf32>,
    return
  }
}

</mosaic_0001>

<bundles_post_ra>
// kernel: tpu_custom_call.1
= control target key start
LH: loop header
LB: loop body
LE: loop exit
PB: predicated region body
PF: predicated region fallthrough
CT: control target
= control target key end

     0   :  { %12 = vsyncpa [#allocation3], 0  ;;  %s2575_s0 = inlined_call_operand.vmem [shape: f32[32,32], index: 0, kind: input, shape index: {}]   ;;  %s2576_s1 = inlined_call_operand.vmem [shape: f32[16,32], index: 1, kind: input, shape index: {}]   ;;  %s2577_s2 = inlined_call_operand.vmem [shape: f32[64,32], index: 2, kind: input, shape index: {}]   ;;  %s2578_s3 = inlined_call_operand.vmem [shape: bf16[32,640], index: 3, kind: input, shape index: {}]   ;;  %s2579_s4 = inlined_call_operand.vmem [shape: bf16[64,32], index: 4, kind: input, shape index: {}]   ;;  %s2580_s5 = inlined_call_operand.vmem [shape: f32[12,128], index: 5, kind: input, shape index: {}]   ;;  %s2581_s6 = inlined_call_operand.hbm [shape: bf16[416,128], index: 6, kind: input, shape index: {}]   ;;  %s2582_s7 = inlined_call_operand.hbm [shape: f32[16,32], index: 7, kind: output, shape index: {}]  }
   0x1   :  { %13 = vsyncpa [#allocation4], 0  ;;  %s2062_s24 = smov [#allocation2]   ;;  %s2014_s28 = scalar_lea.hbm %s2581_s6, 3328 }
   0x2   :  { %s31_s25 = sshll.u32 %s2062_s24, 4  ;;  %p2015_p0 = scmp.ne.s32.totalorder %s2581_s6, %s2014_s28  ;;  %s32_s25 = int_to_ptr.vmem [resolvable:$true] %s31_s25 }
   0x3   :  { %p2018_p1 = scmp.lt.u32.totalorder %s2014_s28, %s2581_s6 }
   0x5   :  { %p2020_p2 = pnand %p2018_p1, %p2015_p0 }
   0x7   :  { %2023 = shalt.err (!%p2020_p2)
}
   0x8   :  { %s2024_s10 = scalar_lea.vmem %s32_s25, 3328  ;;  %p2029_p4 = scmp.lt.s32.totalorder %s32_s25, %s32_s25 }
   0x9   :  { %p2025_p3 = scmp.ne.s32.totalorder %s32_s25, %s2024_s10  ;;  %p2030_p5 = scmp.lt.s32.totalorder %s2024_s10, %s2024_s10 }
   0xb   :  { %p2031_p6 = por %p2030_p5, %p2029_p4 }
   0xd   :  { %p2032_p7 = pnand %p2031_p6, %p2025_p3 }
   0xf   :  { %2035 = shalt.err (!%p2032_p7)
}
  0x10   :  { %s2063_s11 = smov 64   ;;  %s2064_s12 = smov 4  }
  0x11   :  { %37 = dma.hbm_to_vmem [thread:$0]  %s2581_s6, 3328, %s32_s25, [#allocation3], %s2063_s11, %s2063_s11, %s2064_s12  }
  0x12   :  { %2058 = dma.done.wait [#allocation3], 3328  }
  0x13   :  { %2059 = vsyncadd [#allocation3], 4294963968  ;;  %v1959_v0 = vld [vmem:[%s2578_s3] ss:$20 sps:$4 sm:$0xff]   ;;  %v1960_v1 = vld [vmem:[%s2578_s3 + $0x28] ss:$20 sps:$4 sm:$0xff]   ;;  %v144_v24 = vlaneseq }
  0x14   :  { %1665 = vmatprep.subr.bf16.mxu1 %v1959_v0  ;;  %v124_v2 = vld [vmem:[%s2575_s0] sm:$0xff]  ;;  %v125_v3 = vld [vmem:[%s2575_s0 + $0x8] sm:$0xff]  ;;  %vm160_vm0 = vcmask 261120   ;;  %v2141_v4 = vld [vmem:[%s2575_s0 + $0x10] sm:$0xff]  ;;  %v2066_v33 = vmov 0.0   ;;  %s2067_s28 = smov 96  }
  0x15   :  { %1666 = vmatpush3.bf16.msra.mxu1 %v1959_v0  ;;  %v142_v5 = vpack.c.bf16 %v125_v3, %v124_v2  ;;  %v2146_v6 = vld [vmem:[%s2575_s0 + $0x18] sm:$0xff]  ;;  %v1586_v7 = vld [vmem:[#allocation2 + $0x10] sm:$0xff]   ;;  %v1530_v8 = vld [vmem:[#allocation2] sm:$0xff]   ;;  %s2065_s0 = smov 32   ;;  %v2168_v25 = vshrl.u32 %v144_v24, 7  ;;  %1685 = vmatprep.subr.bf16.mxu0 %v2066_v33  ;;  %vm2068_vm1 = vmmov 0  }
  0x16   :  { %1667 = vmatprep.subr.bf16.mxu1 %v1960_v1  ;;  %v1539_v9 = vunpack.c.l.bf16 %v1586_v7  ;;  %v1540_v10 = vunpack.c.h.bf16 %v1586_v7  ;;  %v1531_v11 = vunpack.c.l.bf16 %v1530_v8  ;;  %v1587_v12 = vld [vmem:[#allocation2 + $0x18] sm:$0xff]   ;;  %v1585_v13 = vld [vmem:[#allocation2 + $0x8] sm:$0xff]   ;;  %v1532_v14 = vunpack.c.h.bf16 %v1530_v8  ;;  %v2174_v29 = vld [vmem:[%s2580_s5] sm:$0xff]  ;;  %1693 = vmatprep.mubr.msk.bf16.mxu0 %vm2068_vm1, %v2066_v33 }
  0x17   :  { %1669 = vmatprep.mubr.msk.bf16.mxu1 %vm160_vm0, %v142_v5  ;;  %v1543_v15 = vunpack.c.l.bf16 %v1587_v12  ;;  %v1544_v16 = vunpack.c.h.bf16 %v1587_v12  ;;  %v1535_v17 = vunpack.c.l.bf16 %v1585_v13  ;;  %v143_v18 = vpack.c.bf16 %v2146_v6, %v2141_v4 }
  0x18   :  { %v2151_v19 = vpack.i.bf16 %v1540_v10, %v1539_v9  ;;  %v1536_v20 = vunpack.c.h.bf16 %v1585_v13  ;;  %v2153_v21 = vpack.i.bf16 %v1532_v14, %v1531_v11  ;;  %v146_v28 = vsub.s32 0, %v2168_v25  ;;  %v1588_v9 = vld [vmem:[#allocation2 + $0x40] sm:$0xff]  }
  0x19   :  { %1668 = vmatpush3.bf16.msra.mxu1 %v1960_v1  ;;  %v2157_v22 = vpack.i.bf16 %v1544_v16, %v1543_v15  ;;  %v1547_v10 = vunpack.c.l.bf16 %v1588_v9  ;;  %v1548_v11 = vunpack.c.h.bf16 %v1588_v9  ;;  %vm367_vm2 = vcmask 523264  }
  0x1a   :  { %1850 = vrot.lane.b32.xlu1 %v2151_v19, %s2065_s0  ;;  %1840 = vrot.lane.b32.xlu0 %v2153_v21, %s2065_s0  ;;  %v2161_v23 = vpack.i.bf16 %v1536_v20, %v1535_v17  ;;  %v147_v30 = vrot.slane %v2174_v29, %v146_v28 }
  0x1b   :  { %1673 = vmatprep.subr.bf16.mxu1 %v2066_v33  ;;  %v2204_v12 = vsub.f32 1.0, %v1547_v10  ;;  %v2206_v13 = vsub.f32 1.0, %v1548_v11 }
  0x1c   :  { %1670 = vmatmul.mubr.msk.bf16.vlgmr.msra.gmra.mrb[0].mxu1 %vm160_vm0, %v143_v18 }
  0x1d   :  { %1681 = vmatprep.mubr.msk.bf16.mxu1 %vm2068_vm1, %v2066_v33  ;;  %v363_v14 = vmul.f32 1e+09, %v2204_v12  ;;  %v364_v15 = vmul.f32 1e+09, %v2206_v13 }
  0x1e   :  { %1855 = vrot.lane.b32.xlu1 %v2157_v22, %s2065_s0  ;;  %1845 = vrot.lane.b32.xlu0 %v2161_v23, %s2065_s0 }
  0x8c   :  { %v1851_v26 = vpop.permute.xlu1 %1850  ;;  %v1841_v27 = vpop.permute.xlu0 %1840 }
  0x8d   :  { %v1853_v34 = vunpack.i.h.bf16 %v1851_v26  ;;  %v1852_v35 = vunpack.i.l.bf16 %v1851_v26  ;;  %v1842_v37 = vunpack.i.l.bf16 %v1841_v27  ;;  %v1843_v42 = vunpack.i.h.bf16 %v1841_v27 }
  0x90   :  { %v1856_v31 = vpop.permute.xlu1 %1855  ;;  %v1846_v32 = vpop.permute.xlu0 %1845 }
  0x91   :  { %v1857_v40 = vunpack.i.l.bf16 %v1856_v31  ;;  %v1847_v41 = vunpack.i.l.bf16 %v1846_v32  ;;  %v1858_v44 = vunpack.i.h.bf16 %v1856_v31  ;;  %v1848_v45 = vunpack.i.h.bf16 %v1846_v32  ;;  %v1961_v31 = vld [vmem:[#allocation2 + $0x20] sm:$0xff]   ;;  %v1962_v32 = vld [vmem:[#allocation2 + $0x28] sm:$0xff]  }
  0x92   :  { %1686 = vmatpush3.bf16.msra.mxu0 %v1961_v31 }
  0x93   :  { %1687 = vmatprep.subr.bf16.mxu0 %v2066_v33 }
  0x96   :  { %1688 = vmatpush3.bf16.msra.mxu0 %v1962_v32  ;;  %v525_v32 = vsub.s32 2, %v2168_v25 }
  0x97   :  { %1689 = vmatprep.subr.bf16.mxu0 %v2066_v33 }
  0xef   :  { %v1671_v36 = vpop.f32.mrb[0].mxu1 }
  0xf0   :  { %v2181_v38 = vadd.f32 %v1671_v36, %v147_v30  ;;  %v201_v39 = vpop.f32.mrb[1].mxu1 }
  0xf1   :  { %v202_v43 = vadd.f32 %v201_v39, %v147_v30  ;;  %v1672_v46 = vpop.f32.mrb[2].mxu1 }
  0xf2   :  { %v2183_v47 = vadd.f32 %v1672_v46, %v147_v30  ;;  %v204_v48 = vpop.f32.mrb[3].mxu1 }
  0xf3   :  { %v205_v49 = vadd.f32 %v204_v48, %v147_v30  ;;  %v254_v50 = vmul.f32 %v1857_v40, %v202_v43  ;;  %v250_v51 = vmul.f32 %v1847_v41, %v202_v43  ;;  %v248_v52 = vmul.f32 %v1842_v37, %v202_v43 }
  0xf4   :  { %v252_v53 = vmul.f32 %v1852_v35, %v202_v43 }
  0xf5   :  { %v251_v54 = vmul.f32 %v1848_v45, %v205_v49  ;;  %v249_v55 = vmul.f32 %v1843_v42, %v205_v49  ;;  %v255_v56 = vmul.f32 %v1858_v44, %v205_v49  ;;  %v253_v57 = vmul.f32 %v1853_v34, %v205_v49  ;;  %v1963_v34 = vld [vmem:[#allocation2 + $0x30] sm:$0xff]  }
  0xf6   :  { %v288_v58 = vpack.c.bf16 %v205_v49, %v202_v43  ;;  %1690 = vmatpush3.bf16.msra.mxu0 %v1963_v34  ;;  %v526_v34 = vrot.slane %v2174_v29, %v525_v32 }
  0xf7   :  { %v290_v59 = vpack.c.bf16 %v251_v54, %v250_v51  ;;  %v289_v60 = vpack.c.bf16 %v249_v55, %v248_v52  ;;  %v292_v61 = vpack.c.bf16 %v255_v56, %v254_v50  ;;  %v291_v62 = vpack.c.bf16 %v253_v57, %v252_v53  ;;  %1691 = vmatprep.subr.bf16.mxu0 %v2066_v33 }
  0xf9   :  { %299 = vrot.lane.b32.xlu1 %v290_v59, %s2067_s28  ;;  %297 = vrot.lane.b32.xlu0 %v289_v60, %s2067_s28 }
  0xfd   :  { %303 = vrot.lane.b32.xlu1 %v292_v61, %s2067_s28  ;;  %301 = vrot.lane.b32.xlu0 %v291_v62, %s2067_s28 }
 0x16b   :  { %v298_v63 = vpop.permute.xlu0 %297  ;;  %v300_v1 = vpop.permute.xlu1 %299 }
 0x16c   :  { %v309_v0 = vsel %vm160_vm0, %v298_v63, 0  ;;  %v312_v2 = vsel %vm160_vm0, %v300_v1, 0 }
 0x16d   :  { %1674 = vmatpush3.bf16.xpose.msra.mxu1 %v309_v0 }
 0x16e   :  { %1675 = vmatprep.subr.bf16.mxu1 %v2066_v33 }
 0x16f   :  { %v302_v3 = vpop.permute.xlu0 %301  ;;  %v304_v7 = vpop.permute.xlu1 %303 }
 0x170   :  { %v315_v5 = vsel %vm160_vm0, %v302_v3, 0  ;;  %v318_v8 = vsel %vm160_vm0, %v304_v7, 0 }
 0x175   :  { %1676 = vmatpush3.bf16.xpose.msra.mxu1 %v312_v2 }
 0x176   :  { %1677 = vmatprep.subr.bf16.mxu1 %v2066_v33 }
 0x17d   :  { %1678 = vmatpush3.bf16.xpose.msra.mxu1 %v315_v5 }
 0x17e   :  { %1679 = vmatprep.subr.bf16.mxu1 %v2066_v33 }
 0x185   :  { %1680 = vmatpush3.bf16.xpose.msra.mxu1 %v318_v8 }
 0x186   :  { %1709 = vmatprep.subr.bf16.mxu1 %v2066_v33 }
 0x18c   :  { %1682 = vmatmul.mubr.msk.bf16.vlgmr.msra.gmra.mrb[4].mxu1 %vm160_vm0, %v288_v58 }
 0x18d   :  { %1713 = vmatprep.mubr.msk.bf16.mxu1 %vm2068_vm1, %v2066_v33 }
 0x25f   :  { %v354_v16 = vpop.f32.mrb[4].mxu1 }
 0x260   :  { %v365_v17 = vsub.f32 %v354_v16, %v363_v14  ;;  %v1683_v18 = vpop.f32.mrb[5].mxu1 }
 0x261   :  { %v357_v20 = vpop.f32.mrb[6].mxu1 }
 0x262   :  { %v366_v24 = vsub.f32 %v357_v20, %v364_v15  ;;  %v1684_v26 = vpop.f32.mrb[7].mxu1  ;;  %v368_v27 = vsel %vm367_vm2, %v365_v17, -inf }
 0x263   :  { %369 = vmax.xlane.f32.xlu0 %v368_v27 }
 0x264   :  { %v371_v30 = vsel %vm367_vm2, %v366_v24, -inf }
 0x265   :  { %372 = vmax.xlane.f32.xlu1 %v371_v30 }
 0x276   :  { %1865 = vrot.lane.b32.xlu1 %v2161_v23, %s2063_s11  ;;  %v1964_v23 = vld [vmem:[#allocation2 + $0x38] sm:$0xff]  }
 0x277   :  { %1692 = vmatpush3.bf16.msra.mxu0 %v1964_v23 }
 0x278   :  { %1697 = vmatprep.subr.bf16.mxu0 %v2066_v33 }
 0x279   :  { %1860 = vrot.lane.b32.xlu0 %v2153_v21, %s2063_s11 }
 0x27a   :  { %1875 = vrot.lane.b32.xlu1 %v2157_v22, %s2063_s11 }
 0x27d   :  { %1870 = vrot.lane.b32.xlu0 %v2151_v19, %s2063_s11 }
 0x2f0   :  { %v370_v35 = vpop.xlane.xlu0 %369 }
 0x2f1   :  { %v374_v36 = vsub.f32 %v365_v17, %v370_v35 }
 0x2f2   :  { %v373_v21 = vpop.xlane.xlu1 %372 }
 0x2f3   :  { %v376_v37 = vmul.f32 1.442695, %v374_v36  ;;  %v375_v39 = vsub.f32 %v366_v24, %v373_v21 }
 0x2f4   :  { %v1861_v22 = vpop.permute.xlu0 %1860 }
 0x2f5   :  { %v378_v40 = vmul.f32 1.442695, %v375_v39  ;;  %v1863_v41 = vunpack.i.h.bf16 %v1861_v22  ;;  %v1862_v42 = vunpack.i.l.bf16 %v1861_v22  ;;  %1985 = vpow2.f32 %v376_v37 }
 0x2f6   :  { %v1866_v43 = vpop.permute.xlu1 %1865 }
 0x2f7   :  { %1987 = vpow2.f32 %v378_v40  ;;  %v1868_v19 = vunpack.i.h.bf16 %v1866_v43  ;;  %v1867_v44 = vunpack.i.l.bf16 %v1866_v43  ;;  %v280_v45 = vmul.f32 %v1862_v42, %v2181_v38 }
 0x2f8   :  { %v1871_v46 = vpop.permute.xlu0 %1870  ;;  %v281_v48 = vmul.f32 %v1863_v41, %v2183_v47 }
 0x2f9   :  { %v1873_v49 = vunpack.i.h.bf16 %v1871_v46  ;;  %v1872_v50 = vunpack.i.l.bf16 %v1871_v46  ;;  %v282_v51 = vmul.f32 %v1867_v44, %v2181_v38  ;;  %v283_v52 = vmul.f32 %v1868_v19, %v2183_v47 }
 0x2fa   :  { %v1876_v53 = vpop.permute.xlu1 %1875  ;;  %v454_v54 = vpack.c.bf16 %v281_v48, %v280_v45 }
 0x2fb   :  { %v1878_v55 = vunpack.i.h.bf16 %v1876_v53  ;;  %v1877_v56 = vunpack.i.l.bf16 %v1876_v53  ;;  %v455_v57 = vpack.c.bf16 %v283_v52, %v282_v51  ;;  %v284_v58 = vmul.f32 %v1872_v50, %v2181_v38  ;;  %v1967_v51 = vld [vmem:[%s2578_s3 + $0x4] ss:$20 sps:$4 sm:$0xff]   ;;  %v1968_v52 = vld [vmem:[%s2578_s3 + $0x2c] ss:$20 sps:$4 sm:$0xff]  }
 0x2fc   :  { %462 = vrot.lane.b32.xlu0 %v454_v54, %s2063_s11  ;;  %v285_v59 = vmul.f32 %v1873_v49, %v2183_v47  ;;  %v1589_v53 = vld [vmem:[#allocation2 + $0x48] sm:$0xff]   ;;  %v1590_v54 = vld [vmem:[#allocation2 + $0x50] sm:$0xff]  }
 0x2fd   :  { %464 = vrot.lane.b32.xlu1 %v455_v57, %s2063_s11  ;;  %v286_v60 = vmul.f32 %v1877_v56, %v2181_v38  ;;  %v287_v61 = vmul.f32 %v1878_v55, %v2183_v47  ;;  %v1965_v38 = vld [vmem:[%s2578_s3 + $0x8] ss:$20 sps:$4 sm:$0xff]   ;;  %v1551_v56 = vunpack.c.l.bf16 %v1589_v53  ;;  %v1552_v57 = vunpack.c.h.bf16 %v1589_v53 }
 0x2fe   :  { %v456_v62 = vpack.c.bf16 %v285_v59, %v284_v58  ;;  %1710 = vmatpush3.bf16.msra.mxu1 %v1965_v38  ;;  %v1591_v55 = vld [vmem:[#allocation2 + $0x58] sm:$0xff]   ;;  %v1555_v58 = vunpack.c.l.bf16 %v1590_v54  ;;  %v1556_v59 = vunpack.c.h.bf16 %v1590_v54 }
 0x2ff   :  { %v457_v63 = vpack.c.bf16 %v287_v61, %v286_v60  ;;  %v1986_v0 = vpop.eup %1985  ;;  %1711 = vmatprep.subr.bf16.mxu1 %v2066_v33  ;;  %v1593_v60 = vld [vmem:[#allocation2 + $0x68] sm:$0xff]   ;;  %v1592_v61 = vld [vmem:[#allocation2 + $0x60] sm:$0xff]   ;;  %v2285_v38 = vpack.i.bf16 %v1552_v57, %v1551_v56  ;;  %v133_v53 = vld [vmem:[%s2577_s2 + $0x18] sm:$0xff]  ;;  %v637_v57 = vsub.s32 1, %v2168_v25 }
 0x300   :  { %466 = vrot.lane.b32.xlu0 %v456_v62, %s2063_s11  ;;  %v1559_v62 = vunpack.c.l.bf16 %v1591_v55 }
 0x301   :  { %v1988_v1 = vpop.eup %1987  ;;  %468 = vrot.lane.b32.xlu1 %v457_v63, %s2063_s11  ;;  %v1560_v63 = vunpack.c.h.bf16 %v1591_v55 }
 0x302   :  { %v380_v2 = vpack.c.bf16 %v1988_v1, %v1986_v0 }
 0x304   :  { %1694 = vmatmul.mubr.msk.bf16.vlgmr.msra.gmra.mrb[0].mxu0 %vm367_vm2, %v380_v2  ;;  %v1595_v2 = vld [vmem:[#allocation2 + $0x78] sm:$0xff]  }
 0x305   :  { %1705 = vmatprep.mubr.msk.bf16.mxu0 %vm2068_vm1, %v2066_v33 }
 0x36e   :  { %v463_v47 = vpop.permute.xlu0 %462 }
 0x36f   :  { %1698 = vmatpush3.bf16.msra.mxu0 %v463_v47  ;;  %v465_v3 = vpop.permute.xlu1 %464  ;;  %v2287_v47 = vpack.i.bf16 %v1556_v59, %v1555_v58  ;;  %v2362_v59 = vrot.slane %v2174_v29, %v637_v57 }
 0x370   :  { %1699 = vmatprep.subr.bf16.mxu0 %v2066_v33 }
 0x372   :  { %v467_v5 = vpop.permute.xlu0 %466 }
 0x373   :  { %1700 = vmatpush3.bf16.msra.mxu0 %v465_v3  ;;  %v469_v7 = vpop.permute.xlu1 %468  ;;  %v1563_v3 = vunpack.c.l.bf16 %v1592_v61 }
 0x374   :  { %1701 = vmatprep.subr.bf16.mxu0 %v2066_v33 }
 0x377   :  { %1702 = vmatpush3.bf16.msra.mxu0 %v467_v5  ;;  %v1564_v5 = vunpack.c.h.bf16 %v1592_v61 }
 0x378   :  { %1703 = vmatprep.subr.bf16.mxu0 %v2066_v33 }
 0x37b   :  { %1704 = vmatpush3.bf16.msra.mxu0 %v469_v7  ;;  %v2293_v7 = vpack.i.bf16 %v1560_v63, %v1559_v62 }
 0x37c   :  { %1717 = vmatprep.subr.bf16.mxu0 %v2066_v33 }
 0x3d7   :  { %v442_v8 = vpop.f32.mrb[0].mxu0 }
 0x3d8   :  { %v443_v9 = vadd.f32 %v442_v8, %v2204_v12  ;;  %v1695_v10 = vpop.f32.mrb[1].mxu0  ;;  %v1966_v12 = vld [vmem:[%s2578_s3 + $0x30] ss:$20 sps:$4 sm:$0xff]  }
 0x3d9   :  { %v445_v11 = vpop.f32.mrb[2].mxu0  ;;  %1712 = vmatpush3.bf16.msra.mxu1 %v1966_v12  ;;  %v1576_v10 = vunpack.c.h.bf16 %v1595_v2 }
 0x3da   :  { %1989 = vrcp.f32 %v443_v9  ;;  %v446_v14 = vadd.f32 %v445_v11, %v2206_v13  ;;  %v1696_v15 = vpop.f32.mrb[3].mxu0  ;;  %1741 = vmatprep.subr.bf16.mxu1 %v2066_v33  ;;  %v1575_v9 = vunpack.c.l.bf16 %v1595_v2  ;;  %v1594_v11 = vld [vmem:[#allocation2 + $0x70] sm:$0xff]  }
 0x3dc   :  { %1991 = vrcp.f32 %v446_v14  ;;  %v2301_v14 = vpack.i.bf16 %v1564_v5, %v1563_v3  ;;  %v2303_v15 = vpack.i.bf16 %v1576_v10, %v1575_v9 }
 0x3e4   :  { %v1990_v16 = vpop.eup %1989 }
 0x3e5   :  { %v451_v18 = vmul.f32 %v1990_v16, %v1986_v0  ;;  %v1567_v0 = vunpack.c.l.bf16 %v1593_v60  ;;  %v1571_v16 = vunpack.c.l.bf16 %v1594_v11 }
 0x3e6   :  { %v1992_v17 = vpop.eup %1991 }
 0x3e7   :  { %v452_v20 = vmul.f32 %v1992_v17, %v1988_v1  ;;  %v1568_v1 = vunpack.c.h.bf16 %v1593_v60  ;;  %v1572_v17 = vunpack.c.h.bf16 %v1594_v11 }
 0x3e9   :  { %v453_v24 = vpack.c.bf16 %v452_v20, %v451_v18  ;;  %v2295_v8 = vpack.i.bf16 %v1568_v1, %v1567_v0  ;;  %v1596_v18 = vld [vmem:[#allocation2 + $0x80] sm:$0xff]   ;;  %v2309_v20 = vpack.i.bf16 %v1572_v17, %v1571_v16 }
 0x3ea   :  { %v1580_v12 = vunpack.c.h.bf16 %v1596_v18 }
 0x3eb   :  { %1706 = vmatmul.mubr.msk.bf16.vlgmr.msra.gmra.mrb[4].mxu0 %vm367_vm2, %v453_v24  ;;  %v1579_v24 = vunpack.c.l.bf16 %v1596_v18 }
 0x3ec   :  { %1721 = vmatprep.mubr.msk.bf16.mxu0 %vm2068_vm1, %v2066_v33  ;;  %1718 = vmatpush3.bf16.msra.mxu0 %v1967_v51 }
 0x3ed   :  { %1719 = vmatprep.subr.bf16.mxu0 %v2066_v33 }
 0x3f0   :  { %1720 = vmatpush3.bf16.msra.mxu0 %v1968_v52  ;;  %v132_v52 = vld [vmem:[%s2577_s2 + $0x10] sm:$0xff] }
 0x3f1   :  { %1761 = vmatprep.subr.bf16.mxu0 %v2066_v33  ;;  %v632_v54 = vpack.c.bf16 %v133_v53, %v132_v52 }
 0x4be   :  { %v511_v13 = vpop.f32.mrb[4].mxu0 }
 0x4bf   :  { %v1707_v26 = vpop.f32.mrb[5].mxu0 }
 0x4c0   :  { %v514_v27 = vpop.f32.mrb[6].mxu0 }
 0x4c1   :  { %v522_v30 = vpack.c.bf16 %v514_v27, %v511_v13  ;;  %v1708_v31 = vpop.f32.mrb[7].mxu0  ;;  %v2313_v13 = vpack.i.bf16 %v1580_v12, %v1579_v24 }
 0x4c3   :  { %1714 = vmatmul.mubr.msk.bf16.vlgmr.msra.gmra.mrb[8].mxu1 %vm160_vm0, %v522_v30 }
 0x4c4   :  { %1757 = vmatprep.mubr.msk.bf16.mxu1 %vm2068_vm1, %v2066_v33 }
 0x596   :  { %v576_v23 = vpop.f32.mrb[8].mxu1 }
 0x597   :  { %v577_v35 = vadd.f32 %v576_v23, %v526_v34  ;;  %v1715_v36 = vpop.f32.mrb[9].mxu1 }
 0x598   :  { %v579_v21 = vpop.f32.mrb[10].mxu1 }
 0x599   :  { %v580_v37 = vadd.f32 %v579_v21, %v526_v34  ;;  %v1716_v39 = vpop.f32.mrb[11].mxu1  ;;  %v583_v22 = vadd.f32 %v577_v35, %v2141_v4  ;;  %v614_v35 = vsub.s32 6, %v2168_v25  ;;  %v620_v21 = vsub.s32 7, %v2168_v25 }
 0x59b   :  { %v585_v40 = vsel %vm160_vm0, %v583_v22, 0.0  ;;  %v584_v41 = vadd.f32 %v580_v37, %v2146_v6  ;;  %v615_v36 = vrot.slane %v2174_v29, %v614_v35 }
 0x59c   :  { %586 = vadd.xlane.f32.xlu0 %v585_v40  ;;  %v621_v40 = vrot.slane %v2174_v29, %v620_v21 }
 0x59d   :  { %v588_v42 = vsel %vm160_vm0, %v584_v41, 0.0 }
 0x59e   :  { %589 = vadd.xlane.f32.xlu1 %v588_v42 }
 0x5af   :  { %1880 = vrot.lane.b32.xlu1 %v2285_v38, %s2065_s0 }
 0x5b3   :  { %1890 = vrot.lane.b32.xlu1 %v2293_v7, %s2065_s0 }
 0x5b7   :  { %1895 = vrot.lane.b32.xlu1 %v2301_v14, %s2065_s0 }
 0x5bb   :  { %1905 = vrot.lane.b32.xlu1 %v2309_v20, %s2065_s0 }
 0x5bf   :  { %1915 = vrot.lane.b32.xlu1 %v2313_v13, %s2065_s0 }
 0x629   :  { %v587_v43 = vpop.xlane.xlu0 %586 }
 0x62a   :  { %v592_v19 = vmul.f32 0.03125, %v587_v43 }
 0x62b   :  { %v590_v44 = vpop.xlane.xlu1 %589 }
 0x62c   :  { %v2267_v45 = vsub.f32 %v583_v22, %v592_v19  ;;  %v593_v46 = vmul.f32 0.03125, %v590_v44  ;;  %v128_v44 = vld [vmem:[%s2576_s1] sm:$0xff] }
 0x62e   :  { %v2269_v48 = vsub.f32 %v584_v41, %v593_v46  ;;  %v596_v49 = vmul.f32 %v2267_v45, %v2267_v45  ;;  %v129_v46 = vld [vmem:[%s2576_s1 + $0x8] sm:$0xff] }
 0x62f   :  { %v1881_v55 = vpop.permute.xlu1 %1880 }
 0x630   :  { %v598_v4 = vsel %vm160_vm0, %v596_v49, 0.0  ;;  %v597_v6 = vmul.f32 %v2269_v48, %v2269_v48  ;;  %v1883_v10 = vunpack.i.h.bf16 %v1881_v55  ;;  %v1882_v29 = vunpack.i.l.bf16 %v1881_v55 }
 0x631   :  { %599 = vadd.xlane.f32.xlu0 %v598_v4 }
 0x632   :  { %v601_v50 = vsel %vm160_vm0, %v597_v6, 0.0 }
 0x633   :  { %v1891_v58 = vpop.permute.xlu1 %1890 }
 0x634   :  { %v1892_v17 = vunpack.i.l.bf16 %v1891_v58 }
 0x635   :  { %602 = vadd.xlane.f32.xlu0 %v601_v50  ;;  %v131_v50 = vld [vmem:[%s2577_s2 + $0x8] sm:$0xff] }
 0x637   :  { %v1896_v63 = vpop.permute.xlu1 %1895 }
 0x63b   :  { %v1906_v11 = vpop.permute.xlu1 %1905 }
 0x63c   :  { %v1908_v55 = vunpack.i.h.bf16 %v1906_v11 }
 0x64b   :  { %1885 = vrot.lane.b32.xlu0 %v2287_v47, %s2065_s0 }
 0x64f   :  { %1900 = vrot.lane.b32.xlu0 %v2295_v8, %s2065_s0 }
 0x653   :  { %1910 = vrot.lane.b32.xlu0 %v2303_v15, %s2065_s0 }
 0x6be   :  { %v600_v26 = vpop.xlane.xlu0 %599 }
 0x6bf   :  { %v604_v27 = vmul.f32 0.03125, %v600_v26  ;;  %v1893_v26 = vunpack.i.h.bf16 %v1891_v58 }
 0x6c1   :  { %v606_v30 = vadd.f32 1e-05, %v604_v27 }
 0x6c2   :  { %v603_v31 = vpop.xlane.xlu0 %602 }
 0x6c3   :  { %1993 = vrsqrt.f32 %v606_v30  ;;  %v605_v34 = vmul.f32 0.03125, %v603_v31 }
 0x6c5   :  { %v607_v23 = vadd.f32 1e-05, %v605_v34 }
 0x6c6   :  { %v2356_v56 = vpop.permute.xlu0 %1885 }
 0x6c7   :  { %1995 = vrsqrt.f32 %v607_v23 }
 0x6ca   :  { %v1901_v60 = vpop.permute.xlu0 %1900 }
 0x6cb   :  { %v1902_v16 = vunpack.i.l.bf16 %v1901_v60  ;;  %v1903_v12 = vunpack.i.h.bf16 %v1901_v60 }
 0x6cd   :  { %v1994_v37 = vpop.eup %1993 }
 0x6ce   :  { %v610_v39 = vmul.f32 %v1994_v37, %v2267_v45  ;;  %v1911_v9 = vpop.permute.xlu0 %1910 }
 0x6cf   :  { %v1912_v24 = vunpack.i.l.bf16 %v1911_v9  ;;  %v1913_v30 = vunpack.i.h.bf16 %v1911_v9 }
 0x6d0   :  { %v616_v22 = vmul.f32 %v615_v36, %v610_v39 }
 0x6d1   :  { %v1996_v41 = vpop.eup %1995 }
 0x6d2   :  { %v611_v42 = vmul.f32 %v1996_v41, %v2269_v48  ;;  %v2323_v19 = vadd.f32 %v621_v40, %v616_v22  ;;  %v130_v48 = vld [vmem:[%s2577_s2] sm:$0xff]  ;;  %v1916_v22 = vpop.permute.xlu1 %1915 }
 0x6d3   :  { %v631_v51 = vpack.c.bf16 %v131_v50, %v130_v48  ;;  %v1887_v48 = vunpack.i.l.bf16 %v2356_v56  ;;  %v1897_v50 = vunpack.i.l.bf16 %v1896_v63  ;;  %v1917_v53 = vunpack.i.l.bf16 %v1916_v22 }
 0x6d4   :  { %v617_v43 = vmul.f32 %v615_v36, %v611_v42  ;;  %v624_v45 = vadd.f32 %v2323_v19, %v128_v44  ;;  %v1888_v44 = vunpack.i.h.bf16 %v2356_v56  ;;  %v1918_v60 = vunpack.i.h.bf16 %v1916_v22 }
 0x6d6   :  { %v2331_v49 = vadd.f32 %v621_v40, %v617_v43 }
 0x6d8   :  { %v625_v4 = vadd.f32 %v2331_v49, %v129_v46 }
 0x6da   :  { %v630_v6 = vpack.c.bf16 %v625_v4, %v624_v45 }
 0x6dc   :  { %1722 = vmatmul.mubr.msk.bf16.vlgmr.msra.gmra.mrb[8].mxu0 %vm160_vm0, %v630_v6 }
 0x6dd   :  { %1725 = vmatprep.mubr.msk.bf16.mxu0 %vm2068_vm1, %v2066_v33 }
 0x6e4   :  { %1726 = vmatmul.mubr.msk.bf16.gmra.mrb[12].mxu0 %vm160_vm0, %v631_v51  ;;  %v1907_v51 = vunpack.i.l.bf16 %v1906_v11 }
 0x6e5   :  { %1729 = vmatprep.mubr.msk.bf16.mxu0 %vm2068_vm1, %v2066_v33 }
 0x6ec   :  { %1730 = vmatmul.mubr.msk.bf16.gmra.mrb[16].mxu0 %vm160_vm0, %v632_v54  ;;  %v1898_v54 = vunpack.i.h.bf16 %v1896_v63 }
 0x6ed   :  { %1733 = vmatprep.mubr.msk.bf16.mxu0 %vm2068_vm1, %v2066_v33 }
 0x7af   :  { %v700_v61 = vpop.f32.mrb[8].mxu0 }
 0x7b0   :  { %v1723_v62 = vpop.f32.mrb[9].mxu0  ;;  %v2365_v1 = vadd.f32 %v700_v61, %v2362_v59 }
 0x7b1   :  { %v703_v0 = vpop.f32.mrb[10].mxu0 }
 0x7b2   :  { %v2368_v2 = vadd.f32 %v703_v0, %v2362_v59  ;;  %v1724_v3 = vpop.f32.mrb[11].mxu0 }
 0x7b4   :  { %v883_v5 = vpack.c.bf16 %v2368_v2, %v2365_v1  ;;  %v1969_v1 = vld [vmem:[#allocation2 + $0x88] sm:$0xff]   ;;  %v1970_v2 = vld [vmem:[#allocation2 + $0x90] sm:$0xff]  }
 0x7b5   :  { %1762 = vmatpush3.bf16.msra.mxu0 %v1969_v1 }
 0x7b6   :  { %1763 = vmatprep.subr.bf16.mxu0 %v2066_v33 }
 0x7b7   :  { %v708_v18 = vpop.f32.mrb[12].mxu0 }
 0x7b8   :  { %v709_v27 = vadd.f32 %v708_v18, %v2362_v59  ;;  %v1727_v31 = vpop.f32.mrb[13].mxu0 }
 0x7b9   :  { %v711_v34 = vpop.f32.mrb[14].mxu0  ;;  %1764 = vmatpush3.bf16.msra.mxu0 %v1970_v2 }
 0x7ba   :  { %v712_v23 = vadd.f32 %v711_v34, %v2362_v59  ;;  %v1728_v35 = vpop.f32.mrb[15].mxu0  ;;  %v815_v36 = vmul.f32 %v1912_v24, %v709_v27  ;;  %v803_v21 = vmul.f32 %v1882_v29, %v709_v27  ;;  %v807_v37 = vmul.f32 %v1892_v17, %v709_v27  ;;  %1765 = vmatprep.subr.bf16.mxu0 %v2066_v33 }
 0x7bb   :  { %v811_v39 = vmul.f32 %v1902_v16, %v709_v27  ;;  %v134_v27 = vld [vmem:[%s2577_s2 + $0x20] sm:$0xff] }
 0x7bc   :  { %v804_v40 = vmul.f32 %v1883_v10, %v712_v23  ;;  %v808_v41 = vmul.f32 %v1893_v26, %v712_v23  ;;  %v812_v42 = vmul.f32 %v1903_v12, %v712_v23  ;;  %v816_v43 = vmul.f32 %v1913_v30, %v712_v23  ;;  %v135_v30 = vld [vmem:[%s2577_s2 + $0x28] sm:$0xff] }
 0x7bd   :  { %v633_v31 = vpack.c.bf16 %v135_v30, %v134_v27 }
 0x7be   :  { %v884_v46 = vpack.c.bf16 %v804_v40, %v803_v21  ;;  %v886_v45 = vpack.c.bf16 %v808_v41, %v807_v37  ;;  %v888_v4 = vpack.c.bf16 %v812_v42, %v811_v39  ;;  %v890_v6 = vpack.c.bf16 %v816_v43, %v815_v36 }
 0x7bf   :  { %v716_v52 = vpop.f32.mrb[16].mxu0  ;;  %1734 = vmatmul.mubr.msk.bf16.gmra.mrb[20].mxu0 %vm160_vm0, %v633_v31 }
 0x7c0   :  { %v717_v58 = vadd.f32 %v716_v52, %v2362_v59  ;;  %v1731_v61 = vpop.f32.mrb[17].mxu0  ;;  %900 = vrot.lane.b32.xlu0 %v884_v46, %s2067_s28  ;;  %1737 = vmatprep.mubr.msk.bf16.mxu0 %vm2068_vm1, %v2066_v33  ;;  %v1973_v52 = vld [vmem:[#allocation2 + $0xa8] sm:$0xff]  }
 0x7c1   :  { %v719_v62 = vpop.f32.mrb[18].mxu0 }
 0x7c2   :  { %v720_v0 = vadd.f32 %v719_v62, %v2362_v59  ;;  %v1732_v3 = vpop.f32.mrb[19].mxu0  ;;  %v817_v9 = vmul.f32 %v1917_v53, %v717_v58  ;;  %v805_v10 = vmul.f32 %v1887_v48, %v717_v58  ;;  %v809_v29 = vmul.f32 %v1897_v50, %v717_v58  ;;  %v137_v48 = vld [vmem:[%s2577_s2 + $0x38] sm:$0xff]  ;;  %v1597_v53 = vld [vmem:[#allocation2 + $0xc8] sm:$0xff]  }
 0x7c3   :  { %v813_v56 = vmul.f32 %v1907_v51, %v717_v58  ;;  %v1972_v51 = vld [vmem:[#allocation2 + $0xa0] sm:$0xff]  }
 0x7c4   :  { %904 = vrot.lane.b32.xlu0 %v886_v45, %s2067_s28  ;;  %v806_v16 = vmul.f32 %v1888_v44, %v720_v0  ;;  %v810_v17 = vmul.f32 %v1898_v54, %v720_v0  ;;  %v814_v63 = vmul.f32 %v1908_v55, %v720_v0  ;;  %v818_v11 = vmul.f32 %v1918_v60, %v720_v0 }
 0x7c5   :  { %v1583_v54 = vunpack.c.l.bf16 %v1597_v53  ;;  %v1584_v55 = vunpack.c.h.bf16 %v1597_v53 }
 0x7c6   :  { %v885_v18 = vpack.c.bf16 %v806_v16, %v805_v10  ;;  %v887_v24 = vpack.c.bf16 %v810_v17, %v809_v29  ;;  %v889_v12 = vpack.c.bf16 %v814_v63, %v813_v56  ;;  %v891_v26 = vpack.c.bf16 %v818_v11, %v817_v9  ;;  %v1974_v16 = vld [vmem:[#allocation2 + $0xb0] sm:$0xff]   ;;  %v1975_v17 = vld [vmem:[#allocation2 + $0xb8] sm:$0xff]   ;;  %v1976_v63 = vld [vmem:[#allocation2 + $0xc0] sm:$0xff]  }
 0x7c7   :  { %v2431_v58 = vsub.f32 1.0, %v1583_v54  ;;  %v2433_v60 = vsub.f32 1.0, %v1584_v55 }
 0x7c8   :  { %902 = vrot.lane.b32.xlu1 %v885_v18, %s2067_s28  ;;  %908 = vrot.lane.b32.xlu0 %v888_v4, %s2067_s28 }
 0x7c9   :  { %v986_v61 = vmul.f32 1e+09, %v2431_v58  ;;  %v987_v62 = vmul.f32 1e+09, %v2433_v60 }
 0x7cc   :  { %906 = vrot.lane.b32.xlu1 %v887_v24, %s2067_s28  ;;  %912 = vrot.lane.b32.xlu0 %v890_v6, %s2067_s28  ;;  %v136_v6 = vld [vmem:[%s2577_s2 + $0x30] sm:$0xff] }
 0x7cd   :  { %v634_v50 = vpack.c.bf16 %v137_v48, %v136_v6 }
 0x7cf   :  { %1738 = vmatmul.mubr.msk.bf16.gmra.mrb[24].mxu0 %vm160_vm0, %v634_v50 }
 0x7d0   :  { %910 = vrot.lane.b32.xlu1 %v889_v12, %s2067_s28  ;;  %1777 = vmatprep.mubr.msk.bf16.mxu0 %vm2068_vm1, %v2066_v33 }
 0x7d4   :  { %914 = vrot.lane.b32.xlu1 %v891_v26, %s2067_s28 }
 0x832   :  { %v901_v34 = vpop.permute.xlu0 %900 }
 0x833   :  { %v920_v23 = vsel %vm160_vm0, %v901_v34, 0 }
 0x834   :  { %1742 = vmatpush3.bf16.xpose.msra.mxu1 %v920_v23 }
 0x835   :  { %1743 = vmatprep.subr.bf16.mxu1 %v2066_v33 }
 0x836   :  { %v905_v21 = vpop.permute.xlu0 %904 }
 0x837   :  { %v926_v37 = vsel %vm160_vm0, %v905_v21, 0 }
 0x83a   :  { %v903_v35 = vpop.permute.xlu1 %902  ;;  %v909_v40 = vpop.permute.xlu0 %908 }
 0x83b   :  { %v923_v36 = vsel %vm160_vm0, %v903_v35, 0  ;;  %v932_v41 = vsel %vm160_vm0, %v909_v40, 0 }
 0x83c   :  { %1744 = vmatpush3.bf16.xpose.msra.mxu1 %v923_v36 }
 0x83d   :  { %1745 = vmatprep.subr.bf16.mxu1 %v2066_v33 }
 0x83e   :  { %v907_v39 = vpop.permute.xlu1 %906  ;;  %v913_v44 = vpop.permute.xlu0 %912 }
 0x83f   :  { %v929_v22 = vsel %vm160_vm0, %v907_v39, 0  ;;  %v938_v46 = vsel %vm160_vm0, %v913_v44, 0 }
 0x842   :  { %v911_v42 = vpop.permute.xlu1 %910 }
 0x843   :  { %v935_v43 = vsel %vm160_vm0, %v911_v42, 0 }
 0x844   :  { %1746 = vmatpush3.bf16.xpose.msra.mxu1 %v926_v37 }
 0x845   :  { %1747 = vmatprep.subr.bf16.mxu1 %v2066_v33 }
 0x846   :  { %v915_v45 = vpop.permute.xlu1 %914 }
 0x847   :  { %v941_v4 = vsel %vm160_vm0, %v915_v45, 0 }
 0x84c   :  { %1748 = vmatpush3.bf16.xpose.msra.mxu1 %v929_v22 }
 0x84d   :  { %1749 = vmatprep.subr.bf16.mxu1 %v2066_v33 }
 0x854   :  { %1750 = vmatpush3.bf16.xpose.msra.mxu1 %v932_v41 }
 0x855   :  { %1751 = vmatprep.subr.bf16.mxu1 %v2066_v33 }
 0x85c   :  { %1752 = vmatpush3.bf16.xpose.msra.mxu1 %v935_v43 }
 0x85d   :  { %1753 = vmatprep.subr.bf16.mxu1 %v2066_v33 }
 0x864   :  { %1754 = vmatpush3.bf16.xpose.msra.mxu1 %v938_v46 }
 0x865   :  { %1755 = vmatprep.subr.bf16.mxu1 %v2066_v33 }
 0x86c   :  { %1756 = vmatpush3.bf16.xpose.msra.mxu1 %v941_v4 }
 0x86d   :  { %1801 = vmatprep.subr.bf16.mxu1 %v2066_v33 }
 0x873   :  { %1758 = vmatmul.mubr.msk.bf16.vlgmr.msra.gmra.mrb[12].mxu1 %vm160_vm0, %v883_v5  ;;  %v1971_v5 = vld [vmem:[#allocation2 + $0x98] sm:$0xff]  }
 0x874   :  { %1805 = vmatprep.mubr.msk.bf16.mxu1 %vm2068_vm1, %v2066_v33  ;;  %1766 = vmatpush3.bf16.msra.mxu0 %v1971_v5 }
 0x875   :  { %1767 = vmatprep.subr.bf16.mxu0 %v2066_v33 }
 0x878   :  { %1768 = vmatpush3.bf16.msra.mxu0 %v1972_v51 }
 0x879   :  { %1769 = vmatprep.subr.bf16.mxu0 %v2066_v33 }
 0x87c   :  { %1770 = vmatpush3.bf16.msra.mxu0 %v1973_v52 }
 0x87d   :  { %1771 = vmatprep.subr.bf16.mxu0 %v2066_v33 }
 0x880   :  { %1772 = vmatpush3.bf16.msra.mxu0 %v1974_v16 }
 0x881   :  { %1773 = vmatprep.subr.bf16.mxu0 %v2066_v33 }
 0x884   :  { %1774 = vmatpush3.bf16.msra.mxu0 %v1975_v17 }
 0x885   :  { %1775 = vmatprep.subr.bf16.mxu0 %v2066_v33 }
 0x888   :  { %1776 = vmatpush3.bf16.msra.mxu0 %v1976_v63 }
 0x889   :  { %1781 = vmatprep.subr.bf16.mxu0 %v2066_v33 }
 0x946   :  { %v977_v0 = vpop.f32.mrb[12].mxu1 }
 0x947   :  { %v988_v3 = vsub.f32 %v977_v0, %v986_v61  ;;  %v1759_v9 = vpop.f32.mrb[13].mxu1 }
 0x948   :  { %v980_v10 = vpop.f32.mrb[14].mxu1 }
 0x949   :  { %v989_v29 = vsub.f32 %v980_v10, %v987_v62  ;;  %990 = vmax.xlane.f32.xlu0 %v988_v3  ;;  %v1760_v56 = vpop.f32.mrb[15].mxu1 }
 0x94b   :  { %992 = vmax.xlane.f32.xlu1 %v989_v29 }
 0x95c   :  { %1925 = vrot.lane.b32.xlu1 %v2287_v47, %s2063_s11 }
 0x95f   :  { %1920 = vrot.lane.b32.xlu0 %v2285_v38, %s2063_s11  ;;  %v724_v38 = vpop.f32.mrb[20].mxu0 }
 0x960   :  { %1935 = vrot.lane.b32.xlu1 %v2301_v14, %s2063_s11  ;;  %v1735_v47 = vpop.f32.mrb[21].mxu0 }
 0x963   :  { %1930 = vrot.lane.b32.xlu0 %v2293_v7, %s2063_s11  ;;  %v727_v7 = vpop.f32.mrb[22].mxu0 }
 0x964   :  { %1945 = vrot.lane.b32.xlu1 %v2309_v20, %s2063_s11  ;;  %v1736_v14 = vpop.f32.mrb[23].mxu0  ;;  %v728_v31 = vadd.f32 %v727_v7, %v2362_v59 }
 0x965   :  { %v732_v11 = vpop.f32.mrb[24].mxu0 }
 0x966   :  { %v1739_v20 = vpop.f32.mrb[25].mxu0  ;;  %v733_v23 = vadd.f32 %v732_v11, %v2362_v59 }
 0x967   :  { %1940 = vrot.lane.b32.xlu0 %v2295_v8, %s2063_s11  ;;  %v735_v18 = vpop.f32.mrb[26].mxu0 }
 0x968   :  { %1955 = vrot.lane.b32.xlu1 %v2313_v13, %s2063_s11  ;;  %v1740_v24 = vpop.f32.mrb[27].mxu0  ;;  %v725_v13 = vadd.f32 %v724_v38, %v2362_v59  ;;  %v736_v21 = vadd.f32 %v735_v18, %v2362_v59 }
 0x96b   :  { %1950 = vrot.lane.b32.xlu0 %v2303_v15, %s2063_s11 }
 0x9d6   :  { %v991_v12 = vpop.xlane.xlu0 %990 }
 0x9d7   :  { %v994_v26 = vsub.f32 %v988_v3, %v991_v12 }
 0x9d8   :  { %v993_v8 = vpop.xlane.xlu1 %992 }
 0x9d9   :  { %v996_v27 = vmul.f32 1.442695, %v994_v26  ;;  %v995_v30 = vsub.f32 %v989_v29, %v993_v8 }
 0x9da   :  { %v1921_v34 = vpop.permute.xlu0 %1920 }
 0x9db   :  { %v998_v15 = vmul.f32 1.442695, %v995_v30  ;;  %v1923_v35 = vunpack.i.h.bf16 %v1921_v34  ;;  %v1922_v36 = vunpack.i.l.bf16 %v1921_v34  ;;  %1997 = vpow2.f32 %v996_v27 }
 0x9dc   :  { %v1926_v37 = vpop.permute.xlu1 %1925 }
 0x9dd   :  { %1999 = vpow2.f32 %v998_v15  ;;  %v1928_v39 = vunpack.i.h.bf16 %v1926_v37  ;;  %v1927_v22 = vunpack.i.l.bf16 %v1926_v37  ;;  %v867_v40 = vmul.f32 %v1922_v36, %v725_v13 }
 0x9de   :  { %v868_v41 = vmul.f32 %v1923_v35, %v728_v31  ;;  %v1931_v42 = vpop.permute.xlu0 %1930 }
 0x9df   :  { %v1933_v43 = vunpack.i.h.bf16 %v1931_v42  ;;  %v1932_v44 = vunpack.i.l.bf16 %v1931_v42  ;;  %v869_v46 = vmul.f32 %v1927_v22, %v733_v23  ;;  %v870_v45 = vmul.f32 %v1928_v39, %v736_v21 }
 0x9e0   :  { %v1095_v4 = vpack.c.bf16 %v868_v41, %v867_v40  ;;  %v1936_v6 = vpop.permute.xlu1 %1935 }
 0x9e1   :  { %v1096_v48 = vpack.c.bf16 %v870_v45, %v869_v46  ;;  %v1938_v50 = vunpack.i.h.bf16 %v1936_v6  ;;  %v1937_v1 = vunpack.i.l.bf16 %v1936_v6  ;;  %v871_v2 = vmul.f32 %v1932_v44, %v725_v13 }
 0x9e2   :  { %1111 = vrot.lane.b32.xlu0 %v1095_v4, %s2063_s11  ;;  %v872_v59 = vmul.f32 %v1933_v43, %v728_v31  ;;  %v1941_v5 = vpop.permute.xlu0 %1940 }
 0x9e3   :  { %1113 = vrot.lane.b32.xlu1 %v1096_v48, %s2063_s11  ;;  %v1943_v51 = vunpack.i.h.bf16 %v1941_v5  ;;  %v1942_v52 = vunpack.i.l.bf16 %v1941_v5  ;;  %v873_v53 = vmul.f32 %v1937_v1, %v733_v23  ;;  %v874_v54 = vmul.f32 %v1938_v50, %v736_v21 }
 0x9e4   :  { %v1097_v55 = vpack.c.bf16 %v872_v59, %v871_v2  ;;  %v1946_v61 = vpop.permute.xlu1 %1945  ;;  %v1183_v5 = vsub.s32 3, %v2168_v25 }
 0x9e5   :  { %v1098_v62 = vpack.c.bf16 %v874_v54, %v873_v53  ;;  %v1948_v0 = vunpack.i.h.bf16 %v1946_v61  ;;  %v1947_v3 = vunpack.i.l.bf16 %v1946_v61  ;;  %v875_v9 = vmul.f32 %v1942_v52, %v725_v13  ;;  %v2462_v10 = vpop.eup %1997 }
 0x9e6   :  { %1115 = vrot.lane.b32.xlu0 %v1097_v55, %s2063_s11  ;;  %v876_v29 = vmul.f32 %v1943_v51, %v728_v31  ;;  %v1951_v56 = vpop.permute.xlu0 %1950  ;;  %v2501_v51 = vld [vmem:[%s2580_s5] sm:$0xff] }
 0x9e7   :  { %v2000_v16 = vpop.eup %1999  ;;  %1117 = vrot.lane.b32.xlu1 %v1098_v62, %s2063_s11  ;;  %v1953_v17 = vunpack.i.h.bf16 %v1951_v56  ;;  %v1952_v63 = vunpack.i.l.bf16 %v1951_v56  ;;  %v877_v38 = vmul.f32 %v1947_v3, %v733_v23  ;;  %v878_v47 = vmul.f32 %v1948_v0, %v736_v21 }
 0x9e8   :  { %v1000_v7 = vpack.c.bf16 %v2000_v16, %v2462_v10  ;;  %v1099_v14 = vpack.c.bf16 %v876_v29, %v875_v9  ;;  %v1956_v11 = vpop.permute.xlu1 %1955  ;;  %v1184_v52 = vrot.slane %v2501_v51, %v1183_v5 }
 0x9e9   :  { %v1100_v20 = vpack.c.bf16 %v878_v47, %v877_v38  ;;  %v879_v18 = vmul.f32 %v1952_v63, %v725_v13  ;;  %v880_v24 = vmul.f32 %v1953_v17, %v728_v31  ;;  %v1958_v12 = vunpack.i.h.bf16 %v1956_v11  ;;  %v1977_v13 = vld [vmem:[%s2578_s3 + $0xc] ss:$20 sps:$4 sm:$0xff]  }
 0x9ea   :  { %1778 = vmatmul.mubr.bf16.vlgmr.msra.gmra.mrb[28].mxu0 %v1000_v7  ;;  %1119 = vrot.lane.b32.xlu0 %v1099_v14, %s2063_s11  ;;  %v1957_v26 = vunpack.i.l.bf16 %v1956_v11 }
 0x9eb   :  { %1121 = vrot.lane.b32.xlu1 %v1100_v20, %s2063_s11  ;;  %v1101_v8 = vpack.c.bf16 %v880_v24, %v879_v18  ;;  %v882_v27 = vmul.f32 %v1958_v12, %v736_v21  ;;  %1797 = vmatprep.mubr.msk.bf16.mxu0 %vm2068_vm1, %v2066_v33  ;;  %v1980_v20 = vld [vmem:[%s2578_s3 + $0x38] ss:$20 sps:$4 sm:$0xff]   ;;  %v1981_v18 = vld [vmem:[%s2579_s4] sm:$0xff]  }
 0x9ec   :  { %v881_v30 = vmul.f32 %v1957_v26, %v733_v23  ;;  %1802 = vmatpush3.bf16.msra.mxu1 %v1977_v13  ;;  %v1982_v24 = vld [vmem:[%s2579_s4 + $0x8] sm:$0xff]  }
 0x9ed   :  { %1803 = vmatprep.subr.bf16.mxu1 %v2066_v33  ;;  %v2530_v13 = vld [vmem:[%s2580_s5 + $0x8] sm:$0xf] }
 0x9ee   :  { %1123 = vrot.lane.b32.xlu0 %v1101_v8, %s2063_s11  ;;  %v1102_v34 = vpack.c.bf16 %v882_v27, %v881_v30 }
 0x9f0   :  { %1125 = vrot.lane.b32.xlu1 %v1102_v34, %s2063_s11 }
 0xa54   :  { %v1112_v31 = vpop.permute.xlu0 %1111 }
 0xa55   :  { %1782 = vmatpush3.bf16.msra.mxu0 %v1112_v31  ;;  %v1114_v15 = vpop.permute.xlu1 %1113 }
 0xa56   :  { %1783 = vmatprep.subr.bf16.mxu0 %v2066_v33 }
 0xa58   :  { %v1116_v35 = vpop.permute.xlu0 %1115 }
 0xa59   :  { %1784 = vmatpush3.bf16.msra.mxu0 %v1114_v15  ;;  %v1118_v23 = vpop.permute.xlu1 %1117  ;;  %v1272_v15 = vrot.slane %v2530_v13, %v146_v28  ;;  %v1984_v28 = vld [vmem:[%s2579_s4 + $0x18] sm:$0xff]  }
 0xa5a   :  { %1785 = vmatprep.subr.bf16.mxu0 %v2066_v33 }
 0xa5c   :  { %v1120_v36 = vpop.permute.xlu0 %1119 }
 0xa5d   :  { %1786 = vmatpush3.bf16.msra.mxu0 %v1116_v35  ;;  %v1122_v21 = vpop.permute.xlu1 %1121 }
 0xa5e   :  { %1787 = vmatprep.subr.bf16.mxu0 %v2066_v33 }
 0xa60   :  { %v1124_v37 = vpop.permute.xlu0 %1123 }
 0xa61   :  { %1788 = vmatpush3.bf16.msra.mxu0 %v1118_v23 }
 0xa62   :  { %1789 = vmatprep.subr.bf16.mxu0 %v2066_v33  ;;  %v1126_v39 = vpop.permute.xlu1 %1125 }
 0xa65   :  { %1790 = vmatpush3.bf16.msra.mxu0 %v1120_v36  ;;  %v1278_v36 = vrot.slane %v2530_v13, %v637_v57  ;;  %v1288_v57 = vsub.s32 4, %v2168_v25 }
 0xa66   :  { %1791 = vmatprep.subr.bf16.mxu0 %v2066_v33 }
 0xa69   :  { %1792 = vmatpush3.bf16.msra.mxu0 %v1122_v21 }
 0xa6a   :  { %1793 = vmatprep.subr.bf16.mxu0 %v2066_v33 }
 0xa6d   :  { %1794 = vmatpush3.bf16.msra.mxu0 %v1124_v37 }
 0xa6e   :  { %1795 = vmatprep.subr.bf16.mxu0 %v2066_v33 }
 0xa71   :  { %1796 = vmatpush3.bf16.msra.mxu0 %v1126_v39 }
 0xa72   :  { %1817 = vmatprep.subr.bf16.mxu0 %v2066_v33 }
 0xabd   :  { %v1083_v22 = vpop.f32.mrb[28].mxu0 }
 0xabe   :  { %v1084_v40 = vadd.f32 %v1083_v22, %v2431_v58  ;;  %v1779_v41 = vpop.f32.mrb[29].mxu0  ;;  %v1978_v58 = vld [vmem:[%s2578_s3 + $0x34] ss:$20 sps:$4 sm:$0xff]  }
 0xabf   :  { %v1086_v42 = vpop.f32.mrb[30].mxu0  ;;  %1804 = vmatpush3.bf16.msra.mxu1 %v1978_v58 }
 0xac0   :  { %2001 = vrcp.f32 %v1084_v40  ;;  %v1087_v43 = vadd.f32 %v1086_v42, %v2433_v60  ;;  %v1780_v44 = vpop.f32.mrb[31].mxu0  ;;  %1809 = vmatprep.subr.bf16.mxu1 %v2066_v33  ;;  %v1983_v42 = vld [vmem:[%s2579_s4 + $0x10] sm:$0xff]   ;;  %s2069_s4 = smov [#allocation5]  }
 0xac1   :  { %s1476_s24 = sshll.u32 %s2069_s4, 4  ;;  %s1477_s24 = int_to_ptr.vmem [resolvable:$true] %s1476_s24 }
 0xac2   :  { %2003 = vrcp.f32 %v1087_v43  ;;  %v1289_v43 = vrot.slane %v2501_v51, %v1288_v57  ;;  %s2036_s25 = scalar_lea.vmem %s1477_s24, 256  ;;  %p2041_p9 = scmp.lt.s32.totalorder %s1477_s24, %s1477_s24 }
 0xac3   :  { %p2037_p8 = scmp.ne.s32.totalorder %s1477_s24, %s2036_s25  ;;  %p2042_p10 = scmp.lt.s32.totalorder %s2036_s25, %s2036_s25 }
 0xac5   :  { %p2043_p11 = por %p2042_p10, %p2041_p9 }
 0xac7   :  { %p2044_p12 = pnand %p2043_p11, %p2037_p8 }
 0xaca   :  { %v2002_v46 = vpop.eup %2001 }
 0xacb   :  { %v1092_v4 = vmul.f32 %v2002_v46, %v2462_v10 }
 0xacc   :  { %v2004_v45 = vpop.eup %2003 }
 0xacd   :  { %v1093_v6 = vmul.f32 %v2004_v45, %v2000_v16 }
 0xacf   :  { %v1094_v48 = vpack.c.bf16 %v1093_v6, %v1092_v4 }
 0xad1   :  { %1798 = vmatmul.mubr.bf16.vlgmr.msra.gmra.mrb[32].mxu0 %v1094_v48 }
 0xad2   :  { %1825 = vmatprep.mubr.msk.bf16.mxu0 %vm2068_vm1, %v2066_v33  ;;  %1818 = vmatpush3.bf16.msra.mxu0 %v1981_v18  ;;  %v1460_v18 = vrot.slane %v2530_v13, %v525_v32 }
 0xad3   :  { %1819 = vmatprep.subr.bf16.mxu0 %v2066_v33 }
 0xad6   :  { %1820 = vmatpush3.bf16.msra.mxu0 %v1982_v24 }
 0xad7   :  { %1821 = vmatprep.subr.bf16.mxu0 %v2066_v33 }
 0xada   :  { %1822 = vmatpush3.bf16.msra.mxu0 %v1983_v42 }
 0xadb   :  { %1823 = vmatprep.subr.bf16.mxu0 %v2066_v33 }
 0xade   :  { %1824 = vmatpush3.bf16.msra.mxu0 %v1984_v28 }
 0xba4   :  { %v1169_v60 = vpop.f32.mrb[32].mxu0 }
 0xba5   :  { %v1799_v50 = vpop.f32.mrb[33].mxu0 }
 0xba6   :  { %v1172_v1 = vpop.f32.mrb[34].mxu0 }
 0xba7   :  { %v1180_v2 = vpack.c.bf16 %v1172_v1, %v1169_v60  ;;  %v1800_v59 = vpop.f32.mrb[35].mxu0 }
 0xba9   :  { %1806 = vmatmul.mubr.msk.bf16.vlgmr.msra.gmra.mrb[16].mxu1 %vm160_vm0, %v1180_v2 }
 0xbaa   :  { %1813 = vmatprep.mubr.msk.bf16.mxu1 %vm2068_vm1, %v2066_v33 }
 0xc7c   :  { %v1234_v53 = vpop.f32.mrb[16].mxu1 }
 0xc7d   :  { %v1235_v54 = vadd.f32 %v1234_v53, %v1184_v52  ;;  %v1807_v55 = vpop.f32.mrb[17].mxu1 }
 0xc7e   :  { %v1237_v61 = vpop.f32.mrb[18].mxu1 }
 0xc7f   :  { %v1238_v62 = vadd.f32 %v1237_v61, %v1184_v52  ;;  %v1808_v0 = vpop.f32.mrb[19].mxu1  ;;  %v1241_v3 = vadd.f32 %v1235_v54, %v2323_v19 }
 0xc81   :  { %v1243_v9 = vsel %vm160_vm0, %v1241_v3, 0.0  ;;  %v1242_v10 = vadd.f32 %v1238_v62, %v2331_v49  ;;  %v1979_v49 = vld [vmem:[%s2578_s3 + $0x10] ss:$20 sps:$4 sm:$0xff]  }
 0xc82   :  { %1244 = vadd.xlane.f32.xlu0 %v1243_v9  ;;  %1810 = vmatpush3.bf16.msra.mxu1 %v1979_v49 }
 0xc83   :  { %v1246_v29 = vsel %vm160_vm0, %v1242_v10, 0.0  ;;  %1811 = vmatprep.subr.bf16.mxu1 %v2066_v33  ;;  %v1359_v33 = vsub.s32 5, %v2168_v25 }
 0xc84   :  { %1247 = vadd.xlane.f32.xlu1 %v1246_v29 }
 0xc85   :  { %v1360_v1 = vrot.slane %v2501_v51, %v1359_v33 }
 0xc86   :  { %1812 = vmatpush3.bf16.msra.mxu1 %v1980_v20 }
 0xd0f   :  { %v1245_v56 = vpop.xlane.xlu0 %1244 }
 0xd10   :  { %v1249_v16 = vmul.f32 0.03125, %v1245_v56 }
 0xd11   :  { %v1248_v17 = vpop.xlane.xlu1 %1247 }
 0xd12   :  { %v1251_v63 = vsub.f32 %v1241_v3, %v1249_v16  ;;  %v1250_v38 = vmul.f32 0.03125, %v1248_v17 }
 0xd14   :  { %v1252_v47 = vsub.f32 %v1242_v10, %v1250_v38  ;;  %v1253_v7 = vmul.f32 %v1251_v63, %v1251_v63 }
 0xd16   :  { %v1255_v14 = vsel %vm160_vm0, %v1253_v7, 0.0  ;;  %v1254_v11 = vmul.f32 %v1252_v47, %v1252_v47 }
 0xd17   :  { %1256 = vadd.xlane.f32.xlu0 %v1255_v14 }
 0xd18   :  { %v1258_v19 = vsel %vm160_vm0, %v1254_v11, 0.0 }
 0xd1b   :  { %1259 = vadd.xlane.f32.xlu0 %v1258_v19 }
 0xda4   :  { %v1257_v12 = vpop.xlane.xlu0 %1256 }
 0xda5   :  { %v1261_v26 = vmul.f32 0.03125, %v1257_v12  ;;  %v1466_v12 = vrot.slane %v2530_v13, %v1183_v5 }
 0xda7   :  { %v1263_v8 = vadd.f32 1e-05, %v1261_v26 }
 0xda8   :  { %v1260_v27 = vpop.xlane.xlu0 %1259 }
 0xda9   :  { %2005 = vrsqrt.f32 %v1263_v8  ;;  %v1262_v30 = vmul.f32 0.03125, %v1260_v27 }
 0xdab   :  { %v1264_v34 = vadd.f32 1e-05, %v1262_v30 }
 0xdad   :  { %2007 = vrsqrt.f32 %v1264_v34 }
 0xdb3   :  { %v2006_v31 = vpop.eup %2005 }
 0xdb4   :  { %v1267_v35 = vmul.f32 %v2006_v31, %v1251_v63 }
 0xdb6   :  { %v1273_v21 = vmul.f32 %v1272_v15, %v1267_v35 }
 0xdb7   :  { %v2008_v23 = vpop.eup %2007 }
 0xdb8   :  { %v1268_v37 = vmul.f32 %v2008_v23, %v1252_v47  ;;  %v1279_v22 = vadd.f32 %v1278_v36, %v1273_v21 }
 0xdba   :  { %v1274_v39 = vmul.f32 %v1272_v15, %v1268_v37 }
 0xdbc   :  { %v1280_v40 = vadd.f32 %v1278_v36, %v1274_v39 }
 0xdbe   :  { %v1285_v41 = vpack.c.bf16 %v1280_v40, %v1279_v22 }
 0xdc0   :  { %1814 = vmatmul.mubr.msk.bf16.vlgmr.msra.gmra.mrb[20].mxu1 %vm160_vm0, %v1285_v41 }
 0xe93   :  { %v1339_v44 = vpop.f32.mrb[20].mxu1 }
 0xe94   :  { %v1340_v46 = vadd.f32 %v1339_v44, %v1289_v43  ;;  %v1815_v45 = vpop.f32.mrb[21].mxu1 }
 0xe95   :  { %v1342_v4 = vpop.f32.mrb[22].mxu1 }
 0xe96   :  { %v1343_v6 = vadd.f32 %v1342_v4, %v1289_v43  ;;  %v1816_v48 = vpop.f32.mrb[23].mxu1  ;;  %v1346_v58 = vmax.f32 %v1340_v46, 0.0 }
 0xe98   :  { %v1347_v60 = vmax.f32 %v1343_v6, 0.0 }
 0xe9a   :  { %v1356_v50 = vpack.c.bf16 %v1347_v60, %v1346_v58 }
 0xe9c   :  { %1826 = vmatmul.mubr.msk.bf16.vlgmr.msra.gmra.mrb[36].mxu0 %vm367_vm2, %v1356_v50 }
 0xf6f   :  { %v1422_v2 = vpop.f32.mrb[36].mxu0 }
 0xf70   :  { %v1423_v59 = vadd.f32 %v1422_v2, %v1360_v1  ;;  %v1827_v52 = vpop.f32.mrb[37].mxu0 }
 0xf71   :  { %v1425_v53 = vpop.f32.mrb[38].mxu0 }
 0xf72   :  { %v1426_v54 = vadd.f32 %v1425_v53, %v1360_v1  ;;  %v1828_v55 = vpop.f32.mrb[39].mxu0  ;;  %v1429_v61 = vadd.f32 %v1423_v59, %v1279_v22 }
 0xf74   :  { %v1431_v62 = vsel %vm160_vm0, %v1429_v61, 0.0  ;;  %v1430_v0 = vadd.f32 %v1426_v54, %v1280_v40 }
 0xf75   :  { %1432 = vadd.xlane.f32.xlu1 %v1431_v62 }
 0xf76   :  { %v1434_v3 = vsel %vm160_vm0, %v1430_v0, 0.0 }
 0xf77   :  { %1435 = vadd.xlane.f32.xlu0 %v1434_v3 }
0x1002   :  { %v1433_v9 = vpop.xlane.xlu1 %1432 }
0x1003   :  { %v1437_v10 = vmul.f32 0.03125, %v1433_v9 }
0x1004   :  { %v1436_v29 = vpop.xlane.xlu0 %1435 }
0x1005   :  { %v1439_v56 = vsub.f32 %v1429_v61, %v1437_v10  ;;  %v1438_v16 = vmul.f32 0.03125, %v1436_v29 }
0x1007   :  { %v1440_v51 = vsub.f32 %v1430_v0, %v1438_v16  ;;  %v1441_v17 = vmul.f32 %v1439_v56, %v1439_v56 }
0x1009   :  { %v1443_v63 = vsel %vm160_vm0, %v1441_v17, 0.0  ;;  %v1442_v38 = vmul.f32 %v1440_v51, %v1440_v51 }
0x100a   :  { %1444 = vadd.xlane.f32.xlu1 %v1443_v63 }
0x100b   :  { %v1446_v47 = vsel %vm160_vm0, %v1442_v38, 0.0 }
0x100c   :  { %1447 = vadd.xlane.f32.xlu0 %v1446_v47 }
0x1097   :  { %v1445_v7 = vpop.xlane.xlu1 %1444 }
0x1098   :  { %v1449_v14 = vmul.f32 0.03125, %v1445_v7 }
0x1099   :  { %v1448_v11 = vpop.xlane.xlu0 %1447 }
0x109a   :  { %v1451_v19 = vadd.f32 1e-05, %v1449_v14  ;;  %v1450_v49 = vmul.f32 0.03125, %v1448_v11 }
0x109c   :  { %2009 = vrsqrt.f32 %v1451_v19  ;;  %v1452_v20 = vadd.f32 1e-05, %v1450_v49 }
0x109e   :  { %2011 = vrsqrt.f32 %v1452_v20 }
0x10a6   :  { %v2010_v24 = vpop.eup %2009 }
0x10a7   :  { %v1455_v26 = vmul.f32 %v2010_v24, %v1439_v56 }
0x10a8   :  { %v2012_v8 = vpop.eup %2011 }
0x10a9   :  { %v1461_v27 = vmul.f32 %v1460_v18, %v1455_v26  ;;  %v1456_v30 = vmul.f32 %v2012_v8, %v1440_v51 }
0x10ab   :  { %v1462_v34 = vmul.f32 %v1460_v18, %v1456_v30  ;;  %v1467_v31 = vadd.f32 %v1466_v12, %v1461_v27 }
0x10ad   :  { %v1468_v15 = vadd.f32 %v1466_v12, %v1462_v34  ;;  %1469 = vst.msk [vmem:[#allocation5] sm:$0xff] %vm160_vm0, %v1467_v31 }
0x10af   :  { %1470 = vst.msk [vmem:[#allocation5 + $0x8] sm:$0xff] %vm160_vm0, %v1468_v15 }
0x10b0   :  { %2047 = shalt.err (!%p2044_p12)
}
0x10b1   :  { %s2048_s27 = scalar_lea.hbm %s2582_s7, 256 }
0x10b2   :  { %p2049_p13 = scmp.ne.s32.totalorder %s2582_s7, %s2048_s27  ;;  %p2052_p0 = scmp.lt.u32.totalorder %s2048_s27, %s2582_s7 }
0x10b4   :  { %p2054_p1 = pnand %p2052_p0, %p2049_p13 }
0x10b6   :  { %2057 = shalt.err (!%p2054_p1)
}
0x10b7   :  { %s2070_s2 = smov 128   ;;  %s2071_s9 = smov 8  }
0x10b8   :  { %1482 = dma.vmem_to_hbm [thread:$0]  %s1477_s24, 256, %s2582_s7, [#allocation4], %s2070_s2, %s2070_s2, %s2071_s9  }
0x10b9   :  { %2060 = dma.done.wait [#allocation4], 256  }
0x10ba   :  { %2061 = vsyncadd [#allocation4], 4294967040 }
0x10bb   :  { %1486 = vsyncpa [#allocation3], 1 }
0x10bc   :  { %1487 = vsyncpa [#allocation4], 1 }

</bundles_post_ra>
